<compile_context>
chip_gen: v7x
topology: tpu7x:2x2x1
jax: 0.10.0
libtpu: 0.0.40
codegen_flags: <defaults>
</compile_context>

<pallas_src>
import functools

import jax
import jax.numpy as jnp
from jax.experimental import pallas as pl
from jax.experimental.pallas import tpu as pltpu

_LANE = 128


def _round_up(x, m):
    return ((x + m - 1) // m) * m


def _pad2(x, rows, cols):
    pr, pc = rows - x.shape[0], cols - x.shape[1]
    if pr or pc:
        x = jnp.pad(x, ((0, pr), (0, pc)))
    return x


def _vmem_capacity_bytes():
    """Per-core VMEM capacity; conservative (v7x-class) default if the query fails."""
    try:
        info = pltpu.get_tpu_info()
        cap = getattr(info, "vmem_capacity_bytes", None)
        if cap:
            return int(cap)
    except Exception:
        pass
    return 64 * 1024 * 1024


def _plan_tiles(n, in_p, hid_p, out_p, csz, budget, cap_bytes, force_k_tiling):
    """Pick dispatch mode + tile sizes against a per-core VMEM budget that accounts
    for resident slabs (features, c1w2, weights), the multi-buffered adj row tile,
    double-buffered output tiles, and f32 temporaries."""
    sublane = 16 if csz == 2 else 8
    # Deeper adj pipeline on small-VMEM (v7x-class) parts; default 2 elsewhere.
    adj_buf = 3 if cap_bytes < 100 * 1024 * 1024 else 2

    # Small graphs: everything fits in one fused call (skip the 2nd launch entirely).
    n_sub = _round_up(max(n, sublane), sublane)
    if not force_k_tiling and n_sub <= 512:
        n_pad = n_sub if n_sub <= _LANE else _round_up(n_sub, _LANE)
        return {"mode": "single", "tm": n_pad, "tk": n_pad, "n_pad": n_pad, "adj_buf": 2}

    n_lane = _round_up(n, _LANE)
    max_pad = int(1.15 * n_lane)          # cap zero-padding waste on the N^2 operand
    w_bytes = 2 * (in_p * hid_p + hid_p * out_p) * csz + 4 * (hid_p + out_p)

    def out_tile_bytes(tm):               # sc + conv1 + c1w2 row tiles, double-buffered
        return 2 * tm * (4 * out_p + 4 * hid_p + csz * out_p)

    if not force_k_tiling:
        for tm in (512, 256, 128):        # 128-multiples: lane-aligned K, full MXU M
            n_pad = _round_up(n, tm)
            if n_pad > max_pad:
                continue
            pass1 = (n_pad * in_p * csz + w_bytes
                     + adj_buf * tm * n_pad * csz
                     + out_tile_bytes(tm) + 4 * tm * (in_p + hid_p))
            pass2 = (n_pad * out_p * csz
                     + adj_buf * tm * n_pad * csz + 2 * tm * out_p * 4)
            if max(pass1, pass2) <= budget:
                return {"mode": "resident", "tm": tm, "tk": n_pad, "n_pad": n_pad,
                        "adj_buf": adj_buf}

    # Large graphs: K-tile both N^2 GEMMs so nothing scales VMEM with N.
    for tm in (256, 128):
        for tk in (2048, 1024, 512, 256, 128):
            n_pad = _round_up(n, max(tm, tk))
            if n_pad > max_pad:
                continue
            pass1 = (adj_buf * tm * tk * csz + 2 * tk * in_p * csz + 2 * tm * in_p * csz
                     + w_bytes + out_tile_bytes(tm) + 4 * tm * (in_p + hid_p))
            pass2 = (adj_buf * tm * tk * csz + 2 * tk * out_p * csz + 2 * tm * out_p * 4)
            if max(pass1, pass2) <= budget:
                return {"mode": "ktiled", "tm": tm, "tk": tk, "n_pad": n_pad,
                        "adj_buf": adj_buf}
    return {"mode": "ktiled", "tm": 128, "tk": 128, "n_pad": _round_up(n, _LANE),
            "adj_buf": 2}


# ----------------------------- kernels -------------------------------------------


def _branch_heads(af_f32, feat_rows, w1, w2, m1w, m1b, m2w, m2b):
    """Everything downstream of af = adj @ features for one row tile:
    conv1 = relu(af @ W1), c1w2 = conv1 @ W2 (reassociated second hop), and
    sc = mlp2(relu(mlp1(feat_rows))).  f32 MXU accumulation throughout."""
    cdt = w1.dtype
    conv1 = jnp.maximum(
        jnp.dot(af_f32.astype(cdt), w1, preferred_element_type=jnp.float32), 0.0)
    c1w2 = jnp.dot(conv1.astype(cdt), w2, preferred_element_type=jnp.float32)
    h = jnp.maximum(
        jnp.dot(feat_rows, m1w, preferred_element_type=jnp.float32) + m1b, 0.0)
    sc = jnp.dot(h.astype(cdt), m2w, preferred_element_type=jnp.float32) + m2b
    return sc, conv1, c1w2


def _gcn_single_kernel(adj_ref, feat_ref, w1_ref, w2_ref, m1w_ref, m1b_ref,
                       m2w_ref, m2b_ref, sc_ref, conv1_ref, conv2_ref):
    """Small-graph fast path: whole problem in one call (conv2 fused, no 2nd launch,
    no c1w2 HBM round trip, adj read once)."""
    cdt = w1_ref.dtype
    adj = adj_ref[...]
    af = jnp.dot(adj, feat_ref[...], preferred_element_type=jnp.float32)
    sc, conv1, c1w2 = _branch_heads(af, feat_ref[...], w1_ref[...], w2_ref[...],
                                    m1w_ref[...], m1b_ref[...], m2w_ref[...],
                                    m2b_ref[...])
    sc_ref[...] = sc
    conv1_ref[...] = conv1
    conv2_ref[...] = jnp.dot(adj, c1w2.astype(cdt), preferred_element_type=jnp.float32)


def _gcn_pass1_kernel(adj_ref, feat_ref, w1_ref, w2_ref, m1w_ref, m1b_ref,
                      m2w_ref, m2b_ref, sc_ref, conv1_ref, c1w2_ref, *, tm):
    """Row-tiled pass 1, features resident: conv1, conv1@W2 and the MLP branch.
    MLP rows are sliced from the resident feature slab (no duplicate input stream)."""
    row0 = pl.multiple_of(pl.program_id(0) * tm, tm)
    af = jnp.dot(adj_ref[...], feat_ref[...], preferred_element_type=jnp.float32)
    feat_rows = feat_ref[pl.ds(row0, tm), :]
    sc, conv1, c1w2 = _branch_heads(af, feat_rows, w1_ref[...], w2_ref[...],
                                    m1w_ref[...], m1b_ref[...], m2w_ref[...],
                                    m2b_ref[...])
    sc_ref[...] = sc
    conv1_ref[...] = conv1
    c1w2_ref[...] = c1w2.astype(c1w2_ref.dtype)


def _gcn_pass1_ktiled_kernel(adj_ref, feat_k_ref, feat_rows_ref, w1_ref, w2_ref,
                             m1w_ref, m1b_ref, m2w_ref, m2b_ref,
                             sc_ref, conv1_ref, c1w2_ref, af_acc_ref):
    """Row x K tiled pass 1 for large graphs: adj @ features accumulated over the K
    axis in an f32 VMEM scratch; branch heads run on the last K step.  (The MLP
    branch needs its own feature row tile here — a K block holds the wrong rows.)"""
    k = pl.program_id(1)

    @pl.when(k == 0)
    def _():
        af_acc_ref[...] = jnp.zeros_like(af_acc_ref)

    af_acc_ref[...] += jnp.dot(adj_ref[...], feat_k_ref[...],
                               preferred_element_type=jnp.float32)

    @pl.when(k == pl.num_programs(1) - 1)
    def _():
        sc, conv1, c1w2 = _branch_heads(af_acc_ref[...], feat_rows_ref[...],
                                        w1_ref[...], w2_ref[...], m1w_ref[...],
                                        m1b_ref[...], m2w_ref[...], m2b_ref[...])
        sc_ref[...] = sc
        conv1_ref[...] = conv1
        c1w2_ref[...] = c1w2.astype(c1w2_ref.dtype)


def _gcn_pass2_kernel(adj_ref, c1w2_ref, conv2_ref):
    """conv2 = adj @ (conv1 @ W2): the N^2 GEMM runs against the narrow out_f-wide
    operand.  f32 accumulation directly in the resident output block."""
    @pl.when(pl.program_id(1) == 0)
    def _():
        conv2_ref[...] = jnp.zeros_like(conv2_ref)

    conv2_ref[...] += jnp.dot(adj_ref[...], c1w2_ref[...],
                              preferred_element_type=jnp.float32)


# ----------------------------- dispatch ------------------------------------------


def _forward_padded(adj_p, feat_p, w1_p, w2_p, m1w_p, m1b_p, m2w_p, m2b_p,
                    *, plan, vmem_limit, use_pipeline_mode):
    n_pad, tm, tk = plan["n_pad"], plan["tm"], plan["tk"]
    mode, adj_buf = plan["mode"], plan["adj_buf"]
    cdt = w1_p.dtype
    in_p, hid_p = w1_p.shape
    out_p = w2_p.shape[1]
    f32 = jnp.float32

    def _zero_map(rank, ndim):
        if rank == 1:
            return lambda i: (0,) * ndim
        return lambda i, k: (0,) * ndim

    def const_spec(shape, rank):
        # Grid-invariant operand: keep one VMEM copy (no double-buffering) if supported.
        imap = _zero_map(rank, len(shape))
        if use_pipeline_mode:
            return pl.BlockSpec(shape, imap, pipeline_mode=pl.Buffered(buffer_count=1))
        return pl.BlockSpec(shape, imap)

    def adj_block_spec(block, imap):
        if use_pipeline_mode and adj_buf != 2:
            return pl.BlockSpec(block, imap, pipeline_mode=pl.Buffered(buffer_count=adj_buf))
        return pl.BlockSpec(block, imap)

    weight_args = (w1_p, w2_p, m1w_p, m1b_p, m2w_p, m2b_p)
    weight_shapes = [(in_p, hid_p), (hid_p, out_p), (in_p, hid_p), (1, hid_p),
                     (hid_p, out_p), (1, out_p)]

    if mode == "single":
        full0 = lambda shape: pl.BlockSpec(shape, _zero_map(1, len(shape)))
        return pl.pallas_call(
            _gcn_single_kernel,
            grid=(1,),
            in_specs=[full0((n_pad, n_pad)), full0((n_pad, in_p))]
                     + [full0(s) for s in weight_shapes],
            out_specs=(full0((n_pad, out_p)), full0((n_pad, hid_p)), full0((n_pad, out_p))),
            out_shape=(jax.ShapeDtypeStruct((n_pad, out_p), f32),
                       jax.ShapeDtypeStruct((n_pad, hid_p), f32),
                       jax.ShapeDtypeStruct((n_pad, out_p), f32)),
            compiler_params=pltpu.CompilerParams(
                dimension_semantics=("arbitrary",), vmem_limit_bytes=vmem_limit),
        )(adj_p, feat_p, *weight_args)

    n_rows = n_pad // tm
    n_k = n_pad // tk

    if mode == "resident":
        rowt = lambda cols: pl.BlockSpec((tm, cols), lambda i: (i, 0))
        weight_specs = [const_spec(s, 1) for s in weight_shapes]
        sc_pad, conv1_pad, c1w2 = pl.pallas_call(
            functools.partial(_gcn_pass1_kernel, tm=tm),
            grid=(n_rows,),
            in_specs=[adj_block_spec((tm, n_pad), lambda i: (i, 0)),
                      const_spec((n_pad, in_p), 1)] + weight_specs,
            out_specs=(rowt(out_p), rowt(hid_p), rowt(out_p)),
            out_shape=(jax.ShapeDtypeStruct((n_pad, out_p), f32),
                       jax.ShapeDtypeStruct((n_pad, hid_p), f32),
                       jax.ShapeDtypeStruct((n_pad, out_p), cdt)),
            compiler_params=pltpu.CompilerParams(
                dimension_semantics=("parallel",), vmem_limit_bytes=vmem_limit),
        )(adj_p, feat_p, *weight_args)
    else:  # "ktiled"
        weight_specs = [const_spec(s, 2) for s in weight_shapes]
        sc_pad, conv1_pad, c1w2 = pl.pallas_call(
            _gcn_pass1_ktiled_kernel,
            grid=(n_rows, n_k),
            in_specs=[adj_block_spec((tm, tk), lambda i, k: (i, k)),
                      pl.BlockSpec((tk, in_p), lambda i, k: (k, 0)),
                      pl.BlockSpec((tm, in_p), lambda i, k: (i, 0))] + weight_specs,
            out_specs=(pl.BlockSpec((tm, out_p), lambda i, k: (i, 0)),
                       pl.BlockSpec((tm, hid_p), lambda i, k: (i, 0)),
                       pl.BlockSpec((tm, out_p), lambda i, k: (i, 0))),
            out_shape=(jax.ShapeDtypeStruct((n_pad, out_p), f32),
                       jax.ShapeDtypeStruct((n_pad, hid_p), f32),
                       jax.ShapeDtypeStruct((n_pad, out_p), cdt)),
            scratch_shapes=[pltpu.VMEM((tm, in_p), jnp.float32)],
            compiler_params=pltpu.CompilerParams(
                dimension_semantics=("parallel", "arbitrary"),
                vmem_limit_bytes=vmem_limit),
        )(adj_p, feat_p, feat_p, *weight_args)

    # Pass 2: conv2 = adj @ (conv1 @ W2); K-tiled only when c1w2 cannot stay resident.
    c1w2_spec = (const_spec((n_pad, out_p), 2) if n_k == 1
                 else pl.BlockSpec((tk, out_p), lambda i, k: (k, 0)))
    conv2_pad = pl.pallas_call(
        _gcn_pass2_kernel,
        grid=(n_rows, n_k),
        in_specs=[adj_block_spec((tm, tk), lambda i, k: (i, k)), c1w2_spec],
        out_specs=pl.BlockSpec((tm, out_p), lambda i, k: (i, 0)),
        out_shape=jax.ShapeDtypeStruct((n_pad, out_p), f32),
        compiler_params=pltpu.CompilerParams(
            dimension_semantics=("parallel", "arbitrary"),
            vmem_limit_bytes=vmem_limit),
    )(adj_p, c1w2)

    return sc_pad, conv1_pad, conv2_pad


def graph_convolution_layer(adj, features, w1, w2, m1w, m1b, m2w, m2b, *,
                            compute_dtype=jnp.bfloat16, force_k_tiling=False):
    """Forward pass of the PyTorch graph_convolution_layer.

    compute_dtype applies to adj / features / weights / c1w2 storage (bf16 default:
    the adjacency dominates HBM traffic); MXU accumulation, biases and all outputs
    stay float32.  Pass compute_dtype=jnp.float32 for exact f32 module semantics."""
    n = adj.shape[0]
    in_f, hid_f = w1.shape
    out_f = w2.shape[1]

    in_p, hid_p, out_p = (_round_up(d, _LANE) for d in (in_f, hid_f, out_f))
    cdt = jnp.dtype(compute_dtype)
    csz = cdt.itemsize

    cap = _vmem_capacity_bytes()
    # Generation-aware per-call VMEM limit: ~100 MiB on 128-MiB parts, 48 MiB on v7x-class.
    vmem_limit = 100 * 1024 * 1024 if cap >= 100 * 1024 * 1024 else 48 * 1024 * 1024
    budget = int(vmem_limit * 0.85)

    plan = _plan_tiles(n, in_p, hid_p, out_p, csz, budget, cap, force_k_tiling)
    n_pad = plan["n_pad"]

    adj_p = _pad2(adj, n_pad, n_pad).astype(cdt)
    feat_p = _pad2(features, n_pad, in_p).astype(cdt)
    w1_p = _pad2(w1, in_p, hid_p).astype(cdt)
    w2_p = _pad2(w2, hid_p, out_p).astype(cdt)
    m1w_p = _pad2(m1w, in_p, hid_p).astype(cdt)
    m2w_p = _pad2(m2w, hid_p, out_p).astype(cdt)
    m1b_p = _pad2(jnp.asarray(m1b).reshape(1, -1), 1, hid_p).astype(jnp.float32)
    m2b_p = _pad2(jnp.asarray(m2b).reshape(1, -1), 1, out_p).astype(jnp.float32)
    args = (adj_p, feat_p, w1_p, w2_p, m1w_p, m1b_p, m2w_p, m2b_p)

    try:
        sc_pad, conv1_pad, conv2_pad = _forward_padded(
            *args, plan=plan, vmem_limit=vmem_limit, use_pipeline_mode=True)
    except Exception:
        # pl.Buffered / pipeline_mode not available: fall back to default 2-deep buffering.
        sc_pad, conv1_pad, conv2_pad = _forward_padded(
            *args, plan=plan, vmem_limit=vmem_limit, use_pipeline_mode=False)

    # torch.cat((sc, conv1, conv2), dim=1), assembled outside the kernel so every
    # in-kernel store stays lane-dense / 128-aligned.
    return jnp.concatenate(
        [sc_pad[:n, :out_f], conv1_pad[:n, :hid_f], conv2_pad[:n, :out_f]], axis=1)


# ----------------------------- test harness --------------------------------------


def _kaiming_normal(key, shape):
    # nn.init.kaiming_normal_ (fan_in = shape[1] for 2D weights, gain = sqrt(2))
    fan_in = shape[1]
    return (2.0 / fan_in) ** 0.5 * jax.random.normal(key, shape, dtype=jnp.float32)


def _make_inputs(key, n, in_f, hid_f, out_f):
    ks = jax.random.split(key, 8)
    a = jax.random.uniform(ks[0], (n, n), dtype=jnp.float32)
    a = 0.5 * (a + a.T) + jnp.eye(n, dtype=jnp.float32)
    adj = a / jnp.sum(a, axis=1, keepdims=True)        # dense row-normalized adjacency
    features = jax.random.normal(ks[1], (n, in_f), dtype=jnp.float32)
    w1 = _kaiming_normal(ks[2], (in_f, hid_f))
    w2 = _kaiming_normal(ks[3], (hid_f, out_f))
    m1w = _kaiming_normal(ks[4], (in_f, hid_f))         # pre-transposed: y = x @ W + b
    m1b = 0.1 * jax.random.normal(ks[5], (1, hid_f), dtype=jnp.float32)
    m2w = _kaiming_normal(ks[6], (hid_f, out_f))
    m2b = 0.1 * jax.random.normal(ks[7], (1, out_f), dtype=jnp.float32)
    return adj, features, w1, w2, m1w, m1b, m2w, m2b


def _reference(adj, features, w1, w2, m1w, m1b, m2w, m2b):
    conv1 = jnp.maximum(adj @ features @ w1, 0.0)
    conv2 = adj @ conv1 @ w2
    sc = jnp.maximum(features @ m1w + m1b, 0.0) @ m2w + m2b
    return jnp.concatenate([sc, conv1, conv2], axis=1)


if __name__ == "__main__":
    key = jax.random.PRNGKey(0)
    k_small, k_big = jax.random.split(key)

    # --- small graph: single fused call -------------------------------------------
    N, IN_F, HID_F, OUT_F = 8, 16, 32, 16
    args = _make_inputs(k_small, N, IN_F, HID_F, OUT_F)
    ref = _reference(*args)

    # exact f32 path (module semantics)
    out_f32 = jax.block_until_ready(
        graph_convolution_layer(*args, compute_dtype=jnp.float32))
    assert out_f32.shape == (N, OUT_F + HID_F + OUT_F)
    assert jnp.allclose(out_f32, ref, atol=1e-4, rtol=1e-4)

    # default path: bf16 operands / f32 accumulation (perf default per review)
    out_bf16 = jax.block_until_ready(graph_convolution_layer(*args))
    assert out_bf16.shape == (N, OUT_F + HID_F + OUT_F)
    assert jnp.allclose(out_bf16, ref, atol=1e-1, rtol=1e-1)

    # --- larger graph: row-tiled two-pass path (features/c1w2 resident) -----------
    N2, IN2, HID2, OUT2 = 640, 48, 96, 64
    args2 = _make_inputs(k_big, N2, IN2, HID2, OUT2)
    ref2 = _reference(*args2)
    out2 = jax.block_until_ready(graph_convolution_layer(*args2))
    assert out2.shape == (N2, OUT2 + HID2 + OUT2)
    assert jnp.allclose(out2, ref2, atol=1e-1, rtol=1e-1)

    # --- same graph through the K-tiled large-N fallback ---------------------------
    out2k = jax.block_until_ready(
        graph_convolution_layer(*args2, force_k_tiling=True))
    assert jnp.allclose(out2k, ref2, atol=1e-1, rtol=1e-1)

    print("KERNEL_OK")
</pallas_src>

<mosaic_0001>
module attributes {stable_mosaic.version = 11 : i64} {
  func.func @_gcn_single_kernel(%arg0: i32, %arg1: memref<8x8xf32, #tpu.memory_space<vmem>>, %arg2: memref<8x128xf32, #tpu.memory_space<vmem>>, %arg3: memref<128x128xf32, #tpu.memory_space<vmem>>, %arg4: memref<128x128xf32, #tpu.memory_space<vmem>>, %arg5: memref<128x128xf32, #tpu.memory_space<vmem>>, %arg6: memref<1x128xf32, #tpu.memory_space<vmem>>, %arg7: memref<128x128xf32, #tpu.memory_space<vmem>>, %arg8: memref<1x128xf32, #tpu.memory_space<vmem>>, %arg9: memref<8x128xf32, #tpu.memory_space<vmem>>, %arg10: memref<8x128xf32, #tpu.memory_space<vmem>>, %arg11: memref<8x128xf32, #tpu.memory_space<vmem>>) attributes {dimension_semantics = [#tpu.dimension_semantics<arbitrary>], iteration_bounds = array<i64: 1>, scalar_prefetch = 0 : i64, scratch_operands = 0 : i64, tpu.core_type = #tpu.core_type<tc>, window_params = [{pipeline_mode = #tpu.pipeline_mode<synchronous>, transform_indices = @transform_0, window_bounds = array<i64: 8, 8>}, {pipeline_mode = #tpu.pipeline_mode<synchronous>, transform_indices = @transform_1, window_bounds = array<i64: 8, 128>}, {pipeline_mode = #tpu.pipeline_mode<synchronous>, transform_indices = @transform_2, window_bounds = array<i64: 128, 128>}, {pipeline_mode = #tpu.pipeline_mode<synchronous>, transform_indices = @transform_3, window_bounds = array<i64: 128, 128>}, {pipeline_mode = #tpu.pipeline_mode<synchronous>, transform_indices = @transform_4, window_bounds = array<i64: 128, 128>}, {pipeline_mode = #tpu.pipeline_mode<synchronous>, transform_indices = @transform_5, window_bounds = array<i64: 1, 128>}, {pipeline_mode = #tpu.pipeline_mode<synchronous>, transform_indices = @transform_6, window_bounds = array<i64: 128, 128>}, {pipeline_mode = #tpu.pipeline_mode<synchronous>, transform_indices = @transform_7, window_bounds = array<i64: 1, 128>}, {pipeline_mode = #tpu.pipeline_mode<synchronous>, transform_indices = @transform_8, window_bounds = array<i64: 8, 128>}, {pipeline_mode = #tpu.pipeline_mode<synchronous>, transform_indices = @transform_9, window_bounds = array<i64: 8, 128>}, {pipeline_mode = #tpu.pipeline_mode<synchronous>, transform_indices = @transform_10, window_bounds = array<i64: 8, 128>}]} {
    %c0 = arith.constant 0 : index
    %c0_0 = arith.constant 0 : index
    %0 = vector.load %arg1[%c0, %c0_0] : memref<8x8xf32, #tpu.memory_space<vmem>>, vector<8x8xf32>
    %c0_1 = arith.constant 0 : index
    %c0_2 = arith.constant 0 : index
    %1 = vector.load %arg2[%c0_1, %c0_2] : memref<8x128xf32, #tpu.memory_space<vmem>>, vector<8x128xf32>
    %cst = arith.constant dense<0.000000e+00> : vector<8x128xf32>
    %2 = tpu.matmul %0, %1, %cst {dimension_numbers = #tpu.dot_dimension_numbers<[1], [0], [0], [1], [0, 0, 1, 1], [], []>} : vector<8x8xf32>, vector<8x128xf32>, vector<8x128xf32> -> vector<8x128xf32>
    %c0_3 = arith.constant 0 : index
    %c0_4 = arith.constant 0 : index
    %3 = vector.load %arg2[%c0_3, %c0_4] : memref<8x128xf32, #tpu.memory_space<vmem>>, vector<8x128xf32>
    %c0_5 = arith.constant 0 : index
    %c0_6 = arith.constant 0 : index
    %4 = vector.load %arg3[%c0_5, %c0_6] : memref<128x128xf32, #tpu.memory_space<vmem>>, vector<128x128xf32>
    %c0_7 = arith.constant 0 : index
    %c0_8 = arith.constant 0 : index
    %5 = vector.load %arg4[%c0_7, %c0_8] : memref<128x128xf32, #tpu.memory_space<vmem>>, vector<128x128xf32>
    %c0_9 = arith.constant 0 : index
    %c0_10 = arith.constant 0 : index
    %6 = vector.load %arg5[%c0_9, %c0_10] : memref<128x128xf32, #tpu.memory_space<vmem>>, vector<128x128xf32>
    %c0_11 = arith.constant 0 : index
    %c0_12 = arith.constant 0 : index
    %7 = vector.load %arg6[%c0_11, %c0_12] : memref<1x128xf32, #tpu.memory_space<vmem>>, vector<1x128xf32>
    %c0_13 = arith.constant 0 : index
    %c0_14 = arith.constant 0 : index
    %8 = vector.load %arg7[%c0_13, %c0_14] : memref<128x128xf32, #tpu.memory_space<vmem>>, vector<128x128xf32>
    %c0_15 = arith.constant 0 : index
    %c0_16 = arith.constant 0 : index
    %9 = vector.load %arg8[%c0_15, %c0_16] : memref<1x128xf32, #tpu.memory_space<vmem>>, vector<1x128xf32>
    %cst_17 = arith.constant dense<0.000000e+00> : vector<8x128xf32>
    %10 = tpu.matmul %2, %4, %cst_17 {dimension_numbers = #tpu.dot_dimension_numbers<[1], [0], [0], [1], [0, 0, 1, 1], [], []>} : vector<8x128xf32>, vector<128x128xf32>, vector<8x128xf32> -> vector<8x128xf32>
    %cst_18 = arith.constant 0.000000e+00 : f32
    %11 = vector.broadcast %cst_18 : f32 to vector<8x128xf32>
    %12 = arith.maximumf %10, %11 : vector<8x128xf32>
    %cst_19 = arith.constant dense<0.000000e+00> : vector<8x128xf32>
    %13 = tpu.matmul %12, %5, %cst_19 {dimension_numbers = #tpu.dot_dimension_numbers<[1], [0], [0], [1], [0, 0, 1, 1], [], []>} : vector<8x128xf32>, vector<128x128xf32>, vector<8x128xf32> -> vector<8x128xf32>
    %cst_20 = arith.constant dense<0.000000e+00> : vector<8x128xf32>
    %14 = tpu.matmul %3, %6, %cst_20 {dimension_numbers = #tpu.dot_dimension_numbers<[1], [0], [0], [1], [0, 0, 1, 1], [], []>} : vector<8x128xf32>, vector<128x128xf32>, vector<8x128xf32> -> vector<8x128xf32>
    %15 = vector.broadcast %7 : vector<1x128xf32> to vector<8x128xf32>
    %16 = arith.addf %14, %15 : vector<8x128xf32>
    %cst_21 = arith.constant 0.000000e+00 : f32
    %17 = vector.broadcast %cst_21 : f32 to vector<8x128xf32>
    %18 = arith.maximumf %16, %17 : vector<8x128xf32>
    %cst_22 = arith.constant dense<0.000000e+00> : vector<8x128xf32>
    %19 = tpu.matmul %18, %8, %cst_22 {dimension_numbers = #tpu.dot_dimension_numbers<[1], [0], [0], [1], [0, 0, 1, 1], [], []>} : vector<8x128xf32>, vector<128x128xf32>, vector<8x128xf32> -> vector<8x128xf32>
    %20 = vector.broadcast %9 : vector<1x128xf32> to vector<8x128xf32>
    %21 = arith.addf %19, %20 : vector<8x128xf32>
    %c0_23 = arith.constant 0 : index
    %c0_24 = arith.constant 0 : index
    %22 = vector.load %arg9[%c0_23, %c0_24] : memref<8x128xf32, #tpu.memory_space<vmem>>, vector<8x128xf32>
    tpu.vector_store %arg9[%c0_23, %c0_24], %21 {strides = array<i32>} : memref<8x128xf32, #tpu.memory_space<vmem>>, vector<8x128xf32>,
    %c0_25 = arith.constant 0 : index
    %c0_26 = arith.constant 0 : index
    %23 = vector.load %arg10[%c0_25, %c0_26] : memref<8x128xf32, #tpu.memory_space<vmem>>, vector<8x128xf32>
    tpu.vector_store %arg10[%c0_25, %c0_26], %12 {strides = array<i32>} : memref<8x128xf32, #tpu.memory_space<vmem>>, vector<8x128xf32>,
    %cst_27 = arith.constant dense<0.000000e+00> : vector<8x128xf32>
    %24 = tpu.matmul %0, %13, %cst_27 {dimension_numbers = #tpu.dot_dimension_numbers<[1], [0], [0], [1], [0, 0, 1, 1], [], []>} : vector<8x8xf32>, vector<8x128xf32>, vector<8x128xf32> -> vector<8x128xf32>
    %c0_28 = arith.constant 0 : index
    %c0_29 = arith.constant 0 : index
    %25 = vector.load %arg11[%c0_28, %c0_29] : memref<8x128xf32, #tpu.memory_space<vmem>>, vector<8x128xf32>
    tpu.vector_store %arg11[%c0_28, %c0_29], %24 {strides = array<i32>} : memref<8x128xf32, #tpu.memory_space<vmem>>, vector<8x128xf32>,
    return
  }
  func.func @transform_0(%arg0: i32) -> (i32, i32) {
    %c0_i32 = arith.constant 0 : i32
    %c0_i32_0 = arith.constant 0 : i32
    %c0_i32_1 = arith.constant 0 : i32
    return %c0_i32, %c0_i32_0 : i32, i32
  }
  func.func @transform_1(%arg0: i32) -> (i32, i32) {
    %c0_i32 = arith.constant 0 : i32
    %c0_i32_0 = arith.constant 0 : i32
    %c0_i32_1 = arith.constant 0 : i32
    return %c0_i32, %c0_i32_0 : i32, i32
  }
  func.func @transform_2(%arg0: i32) -> (i32, i32) {
    %c0_i32 = arith.constant 0 : i32
    %c0_i32_0 = arith.constant 0 : i32
    %c0_i32_1 = arith.constant 0 : i32
    return %c0_i32, %c0_i32_0 : i32, i32
  }
  func.func @transform_3(%arg0: i32) -> (i32, i32) {
    %c0_i32 = arith.constant 0 : i32
    %c0_i32_0 = arith.constant 0 : i32
    %c0_i32_1 = arith.constant 0 : i32
    return %c0_i32, %c0_i32_0 : i32, i32
  }
  func.func @transform_4(%arg0: i32) -> (i32, i32) {
    %c0_i32 = arith.constant 0 : i32
    %c0_i32_0 = arith.constant 0 : i32
    %c0_i32_1 = arith.constant 0 : i32
    return %c0_i32, %c0_i32_0 : i32, i32
  }
  func.func @transform_5(%arg0: i32) -> (i32, i32) {
    %c0_i32 = arith.constant 0 : i32
    %c0_i32_0 = arith.constant 0 : i32
    %c0_i32_1 = arith.constant 0 : i32
    return %c0_i32, %c0_i32_0 : i32, i32
  }
  func.func @transform_6(%arg0: i32) -> (i32, i32) {
    %c0_i32 = arith.constant 0 : i32
    %c0_i32_0 = arith.constant 0 : i32
    %c0_i32_1 = arith.constant 0 : i32
    return %c0_i32, %c0_i32_0 : i32, i32
  }
  func.func @transform_7(%arg0: i32) -> (i32, i32) {
    %c0_i32 = arith.constant 0 : i32
    %c0_i32_0 = arith.constant 0 : i32
    %c0_i32_1 = arith.constant 0 : i32
    return %c0_i32, %c0_i32_0 : i32, i32
  }
  func.func @transform_8(%arg0: i32) -> (i32, i32) {
    %c0_i32 = arith.constant 0 : i32
    %c0_i32_0 = arith.constant 0 : i32
    %c0_i32_1 = arith.constant 0 : i32
    return %c0_i32, %c0_i32_0 : i32, i32
  }
  func.func @transform_9(%arg0: i32) -> (i32, i32) {
    %c0_i32 = arith.constant 0 : i32
    %c0_i32_0 = arith.constant 0 : i32
    %c0_i32_1 = arith.constant 0 : i32
    return %c0_i32, %c0_i32_0 : i32, i32
  }
  func.func @transform_10(%arg0: i32) -> (i32, i32) {
    %c0_i32 = arith.constant 0 : i32
    %c0_i32_0 = arith.constant 0 : i32
    %c0_i32_1 = arith.constant 0 : i32
    return %c0_i32, %c0_i32_0 : i32, i32
  }
}

module attributes {stable_mosaic.version = 11 : i64} {
  func.func @_gcn_single_kernel(%arg0: i32, %arg1: memref<8x8xf32, #tpu.memory_space<vmem>>, %arg2: memref<8x128xf32, #tpu.memory_space<vmem>>, %arg3: memref<128x128xf32, #tpu.memory_space<vmem>>, %arg4: memref<128x128xf32, #tpu.memory_space<vmem>>, %arg5: memref<128x128xf32, #tpu.memory_space<vmem>>, %arg6: memref<1x128xf32, #tpu.memory_space<vmem>>, %arg7: memref<128x128xf32, #tpu.memory_space<vmem>>, %arg8: memref<1x128xf32, #tpu.memory_space<vmem>>, %arg9: memref<8x128xf32, #tpu.memory_space<vmem>>, %arg10: memref<8x128xf32, #tpu.memory_space<vmem>>, %arg11: memref<8x128xf32, #tpu.memory_space<vmem>>) attributes {dimension_semantics = [#tpu.dimension_semantics<arbitrary>], iteration_bounds = array<i64: 1>, scalar_prefetch = 0 : i64, scratch_operands = 0 : i64, tpu.core_type = #tpu.core_type<tc>, window_params = [{pipeline_mode = #tpu.pipeline_mode<synchronous>, transform_indices = @transform_0, window_bounds = array<i64: 8, 8>}, {pipeline_mode = #tpu.pipeline_mode<synchronous>, transform_indices = @transform_1, window_bounds = array<i64: 8, 128>}, {pipeline_mode = #tpu.pipeline_mode<synchronous>, transform_indices = @transform_2, window_bounds = array<i64: 128, 128>}, {pipeline_mode = #tpu.pipeline_mode<synchronous>, transform_indices = @transform_3, window_bounds = array<i64: 128, 128>}, {pipeline_mode = #tpu.pipeline_mode<synchronous>, transform_indices = @transform_4, window_bounds = array<i64: 128, 128>}, {pipeline_mode = #tpu.pipeline_mode<synchronous>, transform_indices = @transform_5, window_bounds = array<i64: 1, 128>}, {pipeline_mode = #tpu.pipeline_mode<synchronous>, transform_indices = @transform_6, window_bounds = array<i64: 128, 128>}, {pipeline_mode = #tpu.pipeline_mode<synchronous>, transform_indices = @transform_7, window_bounds = array<i64: 1, 128>}, {pipeline_mode = #tpu.pipeline_mode<synchronous>, transform_indices = @transform_8, window_bounds = array<i64: 8, 128>}, {pipeline_mode = #tpu.pipeline_mode<synchronous>, transform_indices = @transform_9, window_bounds = array<i64: 8, 128>}, {pipeline_mode = #tpu.pipeline_mode<synchronous>, transform_indices = @transform_10, window_bounds = array<i64: 8, 128>}]} {
    %c0 = arith.constant 0 : index
    %c0_0 = arith.constant 0 : index
    %0 = vector.load %arg1[%c0, %c0_0] : memref<8x8xf32, #tpu.memory_space<vmem>>, vector<8x8xf32>
    %c0_1 = arith.constant 0 : index
    %c0_2 = arith.constant 0 : index
    %1 = vector.load %arg2[%c0_1, %c0_2] : memref<8x128xf32, #tpu.memory_space<vmem>>, vector<8x128xf32>
    %cst = arith.constant dense<0.000000e+00> : vector<8x128xf32>
    %2 = tpu.matmul %0, %1, %cst {dimension_numbers = #tpu.dot_dimension_numbers<[1], [0], [0], [1], [0, 0, 1, 1], [], []>} : vector<8x8xf32>, vector<8x128xf32>, vector<8x128xf32> -> vector<8x128xf32>
    %c0_3 = arith.constant 0 : index
    %c0_4 = arith.constant 0 : index
    %3 = vector.load %arg2[%c0_3, %c0_4] : memref<8x128xf32, #tpu.memory_space<vmem>>, vector<8x128xf32>
    %c0_5 = arith.constant 0 : index
    %c0_6 = arith.constant 0 : index
    %4 = vector.load %arg3[%c0_5, %c0_6] : memref<128x128xf32, #tpu.memory_space<vmem>>, vector<128x128xf32>
    %c0_7 = arith.constant 0 : index
    %c0_8 = arith.constant 0 : index
    %5 = vector.load %arg4[%c0_7, %c0_8] : memref<128x128xf32, #tpu.memory_space<vmem>>, vector<128x128xf32>
    %c0_9 = arith.constant 0 : index
    %c0_10 = arith.constant 0 : index
    %6 = vector.load %arg5[%c0_9, %c0_10] : memref<128x128xf32, #tpu.memory_space<vmem>>, vector<128x128xf32>
    %c0_11 = arith.constant 0 : index
    %c0_12 = arith.constant 0 : index
    %7 = vector.load %arg6[%c0_11, %c0_12] : memref<1x128xf32, #tpu.memory_space<vmem>>, vector<1x128xf32>
    %c0_13 = arith.constant 0 : index
    %c0_14 = arith.constant 0 : index
    %8 = vector.load %arg7[%c0_13, %c0_14] : memref<128x128xf32, #tpu.memory_space<vmem>>, vector<128x128xf32>
    %c0_15 = arith.constant 0 : index
    %c0_16 = arith.constant 0 : index
    %9 = vector.load %arg8[%c0_15, %c0_16] : memref<1x128xf32, #tpu.memory_space<vmem>>, vector<1x128xf32>
    %cst_17 = arith.constant dense<0.000000e+00> : vector<8x128xf32>
    %10 = tpu.matmul %2, %4, %cst_17 {dimension_numbers = #tpu.dot_dimension_numbers<[1], [0], [0], [1], [0, 0, 1, 1], [], []>} : vector<8x128xf32>, vector<128x128xf32>, vector<8x128xf32> -> vector<8x128xf32>
    %cst_18 = arith.constant 0.000000e+00 : f32
    %11 = vector.broadcast %cst_18 : f32 to vector<8x128xf32>
    %12 = arith.maximumf %10, %11 : vector<8x128xf32>
    %cst_19 = arith.constant dense<0.000000e+00> : vector<8x128xf32>
    %13 = tpu.matmul %12, %5, %cst_19 {dimension_numbers = #tpu.dot_dimension_numbers<[1], [0], [0], [1], [0, 0, 1, 1], [], []>} : vector<8x128xf32>, vector<128x128xf32>, vector<8x128xf32> -> vector<8x128xf32>
    %cst_20 = arith.constant dense<0.000000e+00> : vector<8x128xf32>
    %14 = tpu.matmul %3, %6, %cst_20 {dimension_numbers = #tpu.dot_dimension_numbers<[1], [0], [0], [1], [0, 0, 1, 1], [], []>} : vector<8x128xf32>, vector<128x128xf32>, vector<8x128xf32> -> vector<8x128xf32>
    %15 = vector.broadcast %7 : vector<1x128xf32> to vector<8x128xf32>
    %16 = arith.addf %14, %15 : vector<8x128xf32>
    %cst_21 = arith.constant 0.000000e+00 : f32
    %17 = vector.broadcast %cst_21 : f32 to vector<8x128xf32>
    %18 = arith.maximumf %16, %17 : vector<8x128xf32>
    %cst_22 = arith.constant dense<0.000000e+00> : vector<8x128xf32>
    %19 = tpu.matmul %18, %8, %cst_22 {dimension_numbers = #tpu.dot_dimension_numbers<[1], [0], [0], [1], [0, 0, 1, 1], [], []>} : vector<8x128xf32>, vector<128x128xf32>, vector<8x128xf32> -> vector<8x128xf32>
    %20 = vector.broadcast %9 : vector<1x128xf32> to vector<8x128xf32>
    %21 = arith.addf %19, %20 : vector<8x128xf32>
    %c0_23 = arith.constant 0 : index
    %c0_24 = arith.constant 0 : index
    %22 = vector.load %arg9[%c0_23, %c0_24] : memref<8x128xf32, #tpu.memory_space<vmem>>, vector<8x128xf32>
    tpu.vector_store %arg9[%c0_23, %c0_24], %21 {strides = array<i32>} : memref<8x128xf32, #tpu.memory_space<vmem>>, vector<8x128xf32>,
    %c0_25 = arith.constant 0 : index
    %c0_26 = arith.constant 0 : index
    %23 = vector.load %arg10[%c0_25, %c0_26] : memref<8x128xf32, #tpu.memory_space<vmem>>, vector<8x128xf32>
    tpu.vector_store %arg10[%c0_25, %c0_26], %12 {strides = array<i32>} : memref<8x128xf32, #tpu.memory_space<vmem>>, vector<8x128xf32>,
    %cst_27 = arith.constant dense<0.000000e+00> : vector<8x128xf32>
    %24 = tpu.matmul %0, %13, %cst_27 {dimension_numbers = #tpu.dot_dimension_numbers<[1], [0], [0], [1], [0, 0, 1, 1], [], []>} : vector<8x8xf32>, vector<8x128xf32>, vector<8x128xf32> -> vector<8x128xf32>
    %c0_28 = arith.constant 0 : index
    %c0_29 = arith.constant 0 : index
    %25 = vector.load %arg11[%c0_28, %c0_29] : memref<8x128xf32, #tpu.memory_space<vmem>>, vector<8x128xf32>
    tpu.vector_store %arg11[%c0_28, %c0_29], %24 {strides = array<i32>} : memref<8x128xf32, #tpu.memory_space<vmem>>, vector<8x128xf32>,
    return
  }
  func.func @transform_0(%arg0: i32) -> (i32, i32) {
    %c0_i32 = arith.constant 0 : i32
    %c0_i32_0 = arith.constant 0 : i32
    %c0_i32_1 = arith.constant 0 : i32
    return %c0_i32, %c0_i32_0 : i32, i32
  }
  func.func @transform_1(%arg0: i32) -> (i32, i32) {
    %c0_i32 = arith.constant 0 : i32
    %c0_i32_0 = arith.constant 0 : i32
    %c0_i32_1 = arith.constant 0 : i32
    return %c0_i32, %c0_i32_0 : i32, i32
  }
  func.func @transform_2(%arg0: i32) -> (i32, i32) {
    %c0_i32 = arith.constant 0 : i32
    %c0_i32_0 = arith.constant 0 : i32
    %c0_i32_1 = arith.constant 0 : i32
    return %c0_i32, %c0_i32_0 : i32, i32
  }
  func.func @transform_3(%arg0: i32) -> (i32, i32) {
    %c0_i32 = arith.constant 0 : i32
    %c0_i32_0 = arith.constant 0 : i32
    %c0_i32_1 = arith.constant 0 : i32
    return %c0_i32, %c0_i32_0 : i32, i32
  }
  func.func @transform_4(%arg0: i32) -> (i32, i32) {
    %c0_i32 = arith.constant 0 : i32
    %c0_i32_0 = arith.constant 0 : i32
    %c0_i32_1 = arith.constant 0 : i32
    return %c0_i32, %c0_i32_0 : i32, i32
  }
  func.func @transform_5(%arg0: i32) -> (i32, i32) {
    %c0_i32 = arith.constant 0 : i32
    %c0_i32_0 = arith.constant 0 : i32
    %c0_i32_1 = arith.constant 0 : i32
    return %c0_i32, %c0_i32_0 : i32, i32
  }
  func.func @transform_6(%arg0: i32) -> (i32, i32) {
    %c0_i32 = arith.constant 0 : i32
    %c0_i32_0 = arith.constant 0 : i32
    %c0_i32_1 = arith.constant 0 : i32
    return %c0_i32, %c0_i32_0 : i32, i32
  }
  func.func @transform_7(%arg0: i32) -> (i32, i32) {
    %c0_i32 = arith.constant 0 : i32
    %c0_i32_0 = arith.constant 0 : i32
    %c0_i32_1 = arith.constant 0 : i32
    return %c0_i32, %c0_i32_0 : i32, i32
  }
  func.func @transform_8(%arg0: i32) -> (i32, i32) {
    %c0_i32 = arith.constant 0 : i32
    %c0_i32_0 = arith.constant 0 : i32
    %c0_i32_1 = arith.constant 0 : i32
    return %c0_i32, %c0_i32_0 : i32, i32
  }
  func.func @transform_9(%arg0: i32) -> (i32, i32) {
    %c0_i32 = arith.constant 0 : i32
    %c0_i32_0 = arith.constant 0 : i32
    %c0_i32_1 = arith.constant 0 : i32
    return %c0_i32, %c0_i32_0 : i32, i32
  }
  func.func @transform_10(%arg0: i32) -> (i32, i32) {
    %c0_i32 = arith.constant 0 : i32
    %c0_i32_0 = arith.constant 0 : i32
    %c0_i32_1 = arith.constant 0 : i32
    return %c0_i32, %c0_i32_0 : i32, i32
  }
}

</mosaic_0001>

<bundles_post_ra>
// kernel: tpu_custom_call.1
= control target key start
LH: loop header
LB: loop body
LE: loop exit
PB: predicated region body
PF: predicated region fallthrough
CT: control target
= control target key end

     0   :  { %16 = vsyncpa [#allocation3], 0  ;;  %s1463_s0 = inlined_call_operand.hbm [shape: f32[8,8], index: 0, kind: input, shape index: {}]   ;;  %s1464_s1 = inlined_call_operand.hbm [shape: f32[8,128], index: 1, kind: input, shape index: {}]   ;;  %s1465_s2 = inlined_call_operand.hbm [shape: f32[128,128], index: 2, kind: input, shape index: {}]   ;;  %s1466_s3 = inlined_call_operand.hbm [shape: f32[128,128], index: 3, kind: input, shape index: {}]   ;;  %s1467_s4 = inlined_call_operand.hbm [shape: f32[128,128], index: 4, kind: input, shape index: {}]   ;;  %s1468_s5 = inlined_call_operand.vmem [shape: f32[1,128], index: 5, kind: input, shape index: {}]   ;;  %s1469_s6 = inlined_call_operand.hbm [shape: f32[128,128], index: 6, kind: input, shape index: {}]   ;;  %s1470_s7 = inlined_call_operand.vmem [shape: f32[1,128], index: 7, kind: input, shape index: {}]   ;;  %s1471_s8 = inlined_call_operand.hbm [shape: f32[8,128], index: 8, kind: output, shape index: {0}]   ;;  %s1472_s9 = inlined_call_operand.hbm [shape: f32[8,128], index: 9, kind: output, shape index: {1}]   ;;  %s1473_s10 = inlined_call_operand.hbm [shape: f32[8,128], index: 10, kind: output, shape index: {2}]  }
   0x1   :  { %17 = vsyncpa [#allocation6], 0 }
   0x2   :  { %18 = vsyncpa [#allocation9], 0 }
   0x3   :  { %19 = vsyncpa [#allocation12], 0 }
   0x4   :  { %20 = vsyncpa [#allocation4], 0 }
   0x5   :  { %21 = vsyncpa [#allocation15], 0  ;;  %s1212_s13 = smov [#allocation5]   ;;  %s1002_s17 = scalar_lea.hbm %s1464_s1, 128 }
   0x6   :  { %s38_s14 = sshll.u32 %s1212_s13, 4  ;;  %p1003_p0 = scmp.ne.s32.totalorder %s1464_s1, %s1002_s17  ;;  %s39_s14 = int_to_ptr.vmem [resolvable:$true] %s38_s14 }
   0x7   :  { %p1006_p1 = scmp.lt.u32.totalorder %s1002_s17, %s1464_s1 }
   0x9   :  { %p1008_p2 = pnand %p1006_p1, %p1003_p0 }
   0xb   :  { %1011 = shalt.err (!%p1008_p2)
}
   0xc   :  { %s1012_s22 = scalar_lea.vmem %s39_s14, 128  ;;  %p1017_p4 = scmp.lt.s32.totalorder %s39_s14, %s39_s14 }
   0xd   :  { %p1013_p3 = scmp.ne.s32.totalorder %s39_s14, %s1012_s22  ;;  %p1018_p5 = scmp.lt.s32.totalorder %s1012_s22, %s1012_s22 }
   0xf   :  { %p1019_p6 = por %p1018_p5, %p1017_p4 }
  0x11   :  { %p1020_p7 = pnand %p1019_p6, %p1013_p3 }
  0x13   :  { %1023 = shalt.err (!%p1020_p7)
}
  0x14   :  { %41 = dma.hbm_to_vmem [thread:$0]  %s1464_s1, 128, %s39_s14, [#allocation6]  }
  0x15   :  { %s1213_s25 = smov [#allocation8]   ;;  %s1214_s27 = smov [#allocation2]  }
  0x16   :  { %s59_s26 = sshll.u32 %s1213_s25, 4  ;;  %s28_s28 = sshll.u32 %s1214_s27, 4  ;;  %s60_s26 = int_to_ptr.vmem [resolvable:$true] %s59_s26  ;;  %s29_s28 = int_to_ptr.vmem [resolvable:$true] %s28_s28 }
  0x17   :  { %s1024_s11 = scalar_lea.hbm %s1466_s3, 2048 }
  0x18   :  { %p1025_p8 = scmp.ne.s32.totalorder %s1466_s3, %s1024_s11  ;;  %p1028_p9 = scmp.lt.u32.totalorder %s1024_s11, %s1466_s3 }
  0x1a   :  { %p1030_p10 = pnand %p1028_p9, %p1025_p8 }
  0x1c   :  { %1033 = shalt.err (!%p1030_p10)
}
  0x1d   :  { %s1034_s1 = scalar_lea.vmem %s60_s26, 2048  ;;  %p1039_p12 = scmp.lt.s32.totalorder %s60_s26, %s60_s26 }
  0x1e   :  { %p1035_p11 = scmp.ne.s32.totalorder %s60_s26, %s1034_s1  ;;  %p1040_p13 = scmp.lt.s32.totalorder %s1034_s1, %s1034_s1 }
  0x20   :  { %p1041_p0 = por %p1040_p13, %p1039_p12 }
  0x22   :  { %p1042_p1 = pnand %p1041_p0, %p1035_p11 }
  0x24   :  { %1045 = shalt.err (!%p1042_p1)
}
  0x25   :  { %s1215_s14 = smov 128   ;;  %s1216_s17 = smov 8  }
  0x26   :  { %65 = dma.hbm_to_vmem [thread:$0]  %s1466_s3, 2048, %s60_s26, [#allocation9], %s1215_s14, %s1215_s14, %s1216_s17  }
  0x27   :  { %s1046_s22 = scalar_lea.hbm %s1463_s0, 128 }
  0x28   :  { %p1047_p2 = scmp.ne.s32.totalorder %s1463_s0, %s1046_s22  ;;  %p1050_p3 = scmp.lt.u32.totalorder %s1046_s22, %s1463_s0 }
  0x2a   :  { %p1052_p4 = pnand %p1050_p3, %p1047_p2 }
  0x2c   :  { %1055 = shalt.err (!%p1052_p4)
}
  0x2d   :  { %s1056_s29 = scalar_lea.vmem %s29_s28, 128  ;;  %p1061_p6 = scmp.lt.s32.totalorder %s29_s28, %s29_s28 }
  0x2e   :  { %p1057_p5 = scmp.ne.s32.totalorder %s29_s28, %s1056_s29  ;;  %p1062_p7 = scmp.lt.s32.totalorder %s1056_s29, %s1056_s29 }
  0x30   :  { %p1063_p8 = por %p1062_p7, %p1061_p6 }
  0x32   :  { %p1064_p9 = pnand %p1063_p8, %p1057_p5 }
  0x34   :  { %1067 = shalt.err (!%p1064_p9)
}
  0x35   :  { %31 = dma.hbm_to_vmem [thread:$0]  %s1463_s0, 128, %s29_s28, [#allocation3]  }
  0x36   :  { %s1217_s30 = smov [#allocation7]   ;;  %s1218_s12 = smov [#allocation10]  }
  0x37   :  { %s47_s11 = sshll.u32 %s1217_s30, 4  ;;  %s71_s13 = sshll.u32 %s1218_s12, 4  ;;  %s48_s11 = int_to_ptr.vmem [resolvable:$true] %s47_s11  ;;  %s72_s13 = int_to_ptr.vmem [resolvable:$true] %s71_s13 }
  0x38   :  { %s1068_s1 = scalar_lea.hbm %s1465_s2, 2048 }
  0x39   :  { %p1069_p10 = scmp.ne.s32.totalorder %s1465_s2, %s1068_s1  ;;  %p1072_p11 = scmp.lt.u32.totalorder %s1068_s1, %s1465_s2 }
  0x3b   :  { %p1074_p12 = pnand %p1072_p11, %p1069_p10 }
  0x3d   :  { %1077 = shalt.err (!%p1074_p12)
}
  0x3e   :  { %s1078_s0 = scalar_lea.vmem %s48_s11, 2048  ;;  %p1083_p0 = scmp.lt.s32.totalorder %s48_s11, %s48_s11 }
  0x3f   :  { %p1079_p13 = scmp.ne.s32.totalorder %s48_s11, %s1078_s0  ;;  %p1084_p1 = scmp.lt.s32.totalorder %s1078_s0, %s1078_s0 }
  0x41   :  { %p1085_p2 = por %p1084_p1, %p1083_p0 }
  0x43   :  { %p1086_p3 = pnand %p1085_p2, %p1079_p13 }
  0x45   :  { %1089 = shalt.err (!%p1086_p3)
}
  0x46   :  { %53 = dma.hbm_to_vmem [thread:$0]  %s1465_s2, 2048, %s48_s11, [#allocation6], %s1215_s14, %s1215_s14, %s1216_s17  }
  0x47   :  { %s1090_s25 = scalar_lea.hbm %s1467_s4, 2048 }
  0x48   :  { %p1091_p4 = scmp.ne.s32.totalorder %s1467_s4, %s1090_s25  ;;  %p1094_p5 = scmp.lt.u32.totalorder %s1090_s25, %s1467_s4 }
  0x4a   :  { %p1096_p6 = pnand %p1094_p5, %p1091_p4 }
  0x4c   :  { %1099 = shalt.err (!%p1096_p6)
}
  0x4d   :  { %s1100_s30 = scalar_lea.vmem %s72_s13, 2048  ;;  %p1105_p8 = scmp.lt.s32.totalorder %s72_s13, %s72_s13 }
  0x4e   :  { %p1101_p7 = scmp.ne.s32.totalorder %s72_s13, %s1100_s30  ;;  %p1106_p9 = scmp.lt.s32.totalorder %s1100_s30, %s1100_s30 }
  0x50   :  { %p1107_p10 = por %p1106_p9, %p1105_p8 }
  0x52   :  { %p1108_p11 = pnand %p1107_p10, %p1101_p7 }
  0x54   :  { %1111 = shalt.err (!%p1108_p11)
}
  0x55   :  { %77 = dma.hbm_to_vmem [thread:$0]  %s1467_s4, 2048, %s72_s13, [#allocation9], %s1215_s14, %s1215_s14, %s1216_s17  }
  0x56   :  { %s1219_s12 = smov [#allocation11]   ;;  %s1112_s18 = scalar_lea.hbm %s1469_s6, 2048 }
  0x57   :  { %s85_s15 = sshll.u32 %s1219_s12, 4  ;;  %p1113_p12 = scmp.ne.s32.totalorder %s1469_s6, %s1112_s18  ;;  %s86_s15 = int_to_ptr.vmem [resolvable:$true] %s85_s15 }
  0x58   :  { %p1116_p13 = scmp.lt.u32.totalorder %s1112_s18, %s1469_s6 }
  0x5a   :  { %p1118_p0 = pnand %p1116_p13, %p1113_p12 }
  0x5c   :  { %1121 = shalt.err (!%p1118_p0)
}
  0x5d   :  { %s1122_s28 = scalar_lea.vmem %s86_s15, 2048  ;;  %p1127_p2 = scmp.lt.s32.totalorder %s86_s15, %s86_s15 }
  0x5e   :  { %p1123_p1 = scmp.ne.s32.totalorder %s86_s15, %s1122_s28  ;;  %p1128_p3 = scmp.lt.s32.totalorder %s1122_s28, %s1122_s28 }
  0x60   :  { %p1129_p4 = por %p1128_p3, %p1127_p2 }
  0x62   :  { %p1130_p5 = pnand %p1129_p4, %p1123_p1 }
  0x64   :  { %1133 = shalt.err (!%p1130_p5)
}
  0x65   :  { %91 = dma.hbm_to_vmem [thread:$0]  %s1469_s6, 2048, %s86_s15, [#allocation12], %s1215_s14, %s1215_s14, %s1216_s17  }
  0x66   :  { %1200 = dma.done.wait [#allocation3], 128  }
  0x67   :  { %1201 = vsyncadd [#allocation3], 4294967168 }
  0x68   :  { %1202 = dma.done.wait [#allocation6], 2176  }
  0x69   :  { %1203 = vsyncadd [#allocation6], 4294965120 }
  0x6a   :  { %1204 = dma.done.wait [#allocation9], 4096  }
  0x6b   :  { %1205 = vsyncadd [#allocation9], 4294963200 }
  0x6c   :  { %1206 = dma.done.wait [#allocation12], 2048  }
  0x6d   :  { %1207 = vsyncadd [#allocation12], 4294965248  ;;  %v1220_v0 = vmov 0.0   ;;  %vm1221_vm0 = vmmov 0   ;;  %v1222_v1 = vmov 0.0|0.0   ;;  %vm114_vm1 = vcmask 64512  }
  0x6e   :  { %742 = vmatprep.subr.mxu0 %v1220_v0  ;;  %744 = vmatprep.mubr.msk.f32.mxu0 %vm1221_vm0, %v1220_v0  ;;  %v1371_v2 = vld [vmem:[#allocation5] sm:$0xff]  ;;  %v1373_v3 = vld [vmem:[#allocation2] sm:$0xff]  ;;  %v188_v4 = vld [vmem:[#allocation7] sm:$0xff]  ;;  %s1224_s24 = smov [#allocation13]  }
  0x6f   :  { %892 = vmatprep.subr.bf16.mxu1 %v1222_v1  ;;  %779 = vmatprep.mubr.msk.f32.mxu1 %vm1221_vm0, %v1220_v0  ;;  %v189_v5 = vld [vmem:[#allocation7 + $0x8] sm:$0xff]  ;;  %v190_v6 = vld [vmem:[#allocation7 + $0x10] sm:$0xff]  ;;  %v191_v7 = vld [vmem:[#allocation7 + $0x18] sm:$0xff]  ;;  %s627_s25 = sshll.u32 %s1224_s24, 4  ;;  %s628_s25 = int_to_ptr.vmem [resolvable:$true] %s627_s25 }
  0x70   :  { %743 = vmatpush3.msra.mxu0 %v1371_v2  ;;  %v893_v8 = vpack.c.bf16 %v189_v5, %v188_v4  ;;  %v896_v9 = vpack.c.bf16 %v191_v7, %v190_v6  ;;  %v192_v10 = vld [vmem:[#allocation7 + $0x20] sm:$0xff]  ;;  %v193_v11 = vld [vmem:[#allocation7 + $0x28] sm:$0xff]  ;;  %v194_v13 = vld [vmem:[#allocation7 + $0x30] sm:$0xff] }
  0x71   :  { %745 = vmatmul.mubr.msk.f32.vlgmr.msra.gmra.mrb[0].mxu0 %vm114_vm1, %v1373_v3  ;;  %916 = vmatprep.subr.bf16.mxu0 %v1222_v1  ;;  %v899_v12 = vpack.c.bf16 %v193_v11, %v192_v10  ;;  %v195_v14 = vld [vmem:[#allocation7 + $0x38] sm:$0xff]  ;;  %v196_v16 = vld [vmem:[#allocation7 + $0x40] sm:$0xff]  ;;  %v197_v17 = vld [vmem:[#allocation7 + $0x48] sm:$0xff] }
  0x72   :  { %814 = vmatprep.mubr.msk.f32.mxu0 %vm1221_vm0, %v1220_v0  ;;  %894 = vmatpush3.bf16.msra.mxu1 %v893_v8  ;;  %v902_v15 = vpack.c.bf16 %v195_v14, %v194_v13  ;;  %v905_v18 = vpack.c.bf16 %v197_v17, %v196_v16  ;;  %v198_v19 = vld [vmem:[#allocation7 + $0x50] sm:$0xff]  ;;  %v199_v20 = vld [vmem:[#allocation7 + $0x58] sm:$0xff]  ;;  %v200_v22 = vld [vmem:[#allocation7 + $0x60] sm:$0xff] }
  0x73   :  { %895 = vmatprep.subr.bf16.mxu1 %v1222_v1  ;;  %v908_v21 = vpack.c.bf16 %v199_v20, %v198_v19  ;;  %v201_v23 = vld [vmem:[#allocation7 + $0x68] sm:$0xff]  ;;  %v202_v25 = vld [vmem:[#allocation7 + $0x70] sm:$0xff]  ;;  %v203_v26 = vld [vmem:[#allocation7 + $0x78] sm:$0xff] }
  0x74   :  { %v911_v24 = vpack.c.bf16 %v201_v23, %v200_v22  ;;  %v914_v27 = vpack.c.bf16 %v203_v26, %v202_v25  ;;  %v204_v28 = vld [vmem:[#allocation8] sm:$0xff]  ;;  %v205_v29 = vld [vmem:[#allocation8 + $0x8] sm:$0xff]  ;;  %v206_v31 = vld [vmem:[#allocation8 + $0x10] sm:$0xff] }
  0x75   :  { %v917_v30 = vpack.c.bf16 %v205_v29, %v204_v28  ;;  %v207_v32 = vld [vmem:[#allocation8 + $0x18] sm:$0xff]  ;;  %v208_v34 = vld [vmem:[#allocation8 + $0x20] sm:$0xff]  ;;  %v209_v35 = vld [vmem:[#allocation8 + $0x28] sm:$0xff] }
  0x76   :  { %897 = vmatpush3.bf16.msra.mxu1 %v896_v9  ;;  %v920_v33 = vpack.c.bf16 %v207_v32, %v206_v31  ;;  %v923_v36 = vpack.c.bf16 %v209_v35, %v208_v34  ;;  %v210_v37 = vld [vmem:[#allocation8 + $0x30] sm:$0xff]  ;;  %v211_v38 = vld [vmem:[#allocation8 + $0x38] sm:$0xff]  ;;  %v212_v40 = vld [vmem:[#allocation8 + $0x40] sm:$0xff] }
  0x77   :  { %898 = vmatprep.subr.bf16.mxu1 %v1222_v1  ;;  %918 = vmatpush3.bf16.msra.mxu0 %v917_v30  ;;  %v926_v39 = vpack.c.bf16 %v211_v38, %v210_v37  ;;  %v213_v41 = vld [vmem:[#allocation8 + $0x48] sm:$0xff]  ;;  %v214_v43 = vld [vmem:[#allocation8 + $0x50] sm:$0xff]  ;;  %v215_v44 = vld [vmem:[#allocation8 + $0x58] sm:$0xff] }
  0x78   :  { %919 = vmatprep.subr.bf16.mxu0 %v1222_v1  ;;  %v929_v42 = vpack.c.bf16 %v213_v41, %v212_v40  ;;  %v932_v45 = vpack.c.bf16 %v215_v44, %v214_v43  ;;  %v216_v46 = vld [vmem:[#allocation8 + $0x60] sm:$0xff]  ;;  %v217_v47 = vld [vmem:[#allocation8 + $0x68] sm:$0xff]  ;;  %v222_v52 = vld [vmem:[#allocation10 + $0x10] sm:$0xff] }
  0x79   :  { %v935_v48 = vpack.c.bf16 %v217_v47, %v216_v46  ;;  %v220_v49 = vld [vmem:[#allocation10] sm:$0xff]  ;;  %v221_v50 = vld [vmem:[#allocation10 + $0x8] sm:$0xff]  ;;  %v223_v53 = vld [vmem:[#allocation10 + $0x18] sm:$0xff] }
  0x7a   :  { %900 = vmatpush3.bf16.msra.mxu1 %v899_v12  ;;  %v941_v51 = vpack.c.bf16 %v221_v50, %v220_v49  ;;  %v944_v56 = vpack.c.bf16 %v223_v53, %v222_v52  ;;  %v224_v57 = vld [vmem:[#allocation10 + $0x20] sm:$0xff]  ;;  %v225_v58 = vld [vmem:[#allocation10 + $0x28] sm:$0xff]  ;;  %v226_v60 = vld [vmem:[#allocation10 + $0x30] sm:$0xff] }
  0x7b   :  { %901 = vmatprep.subr.bf16.mxu1 %v1222_v1  ;;  %921 = vmatpush3.bf16.msra.mxu0 %v920_v33  ;;  %v947_v59 = vpack.c.bf16 %v225_v58, %v224_v57  ;;  %v227_v61 = vld [vmem:[#allocation10 + $0x38] sm:$0xff]  ;;  %v228_v63 = vld [vmem:[#allocation10 + $0x40] sm:$0xff]  ;;  %v229_v4 = vld [vmem:[#allocation10 + $0x48] sm:$0xff] }
  0x7c   :  { %922 = vmatprep.subr.bf16.mxu0 %v1222_v1  ;;  %v950_v62 = vpack.c.bf16 %v227_v61, %v226_v60  ;;  %v953_v5 = vpack.c.bf16 %v229_v4, %v228_v63  ;;  %v230_v6 = vld [vmem:[#allocation10 + $0x50] sm:$0xff]  ;;  %v231_v7 = vld [vmem:[#allocation10 + $0x58] sm:$0xff]  ;;  %v232_v9 = vld [vmem:[#allocation10 + $0x60] sm:$0xff] }
  0x7d   :  { %v956_v8 = vpack.c.bf16 %v231_v7, %v230_v6  ;;  %v233_v10 = vld [vmem:[#allocation10 + $0x68] sm:$0xff]  ;;  %v234_v12 = vld [vmem:[#allocation10 + $0x70] sm:$0xff]  ;;  %v235_v13 = vld [vmem:[#allocation10 + $0x78] sm:$0xff] }
  0x7e   :  { %903 = vmatpush3.bf16.msra.mxu1 %v902_v15  ;;  %v959_v11 = vpack.c.bf16 %v233_v10, %v232_v9  ;;  %v962_v14 = vpack.c.bf16 %v235_v13, %v234_v12  ;;  %v218_v15 = vld [vmem:[#allocation8 + $0x70] sm:$0xff]  ;;  %v219_v16 = vld [vmem:[#allocation8 + $0x78] sm:$0xff]  ;;  %v238_v19 = vld [vmem:[#allocation11 + $0x8] sm:$0xff] }
  0x7f   :  { %904 = vmatprep.subr.bf16.mxu1 %v1222_v1  ;;  %924 = vmatpush3.bf16.msra.mxu0 %v923_v36  ;;  %v938_v17 = vpack.c.bf16 %v219_v16, %v218_v15  ;;  %v240_v25 = vld [vmem:[#allocation11 + $0x18] sm:$0xff]  ;;  %v241_v26 = vld [vmem:[#allocation11 + $0x20] sm:$0xff]  ;;  %v243_v29 = vld [vmem:[#allocation11 + $0x30] sm:$0xff] }
  0x80   :  { %925 = vmatprep.subr.bf16.mxu0 %v1222_v1  ;;  %v244_v30 = vld [vmem:[#allocation11 + $0x38] sm:$0xff]  ;;  %v245_v32 = vld [vmem:[#allocation11 + $0x40] sm:$0xff]  ;;  %v246_v33 = vld [vmem:[#allocation11 + $0x48] sm:$0xff] }
  0x81   :  { %v974_v31 = vpack.c.bf16 %v244_v30, %v243_v29  ;;  %v977_v34 = vpack.c.bf16 %v246_v33, %v245_v32  ;;  %v248_v35 = vld [vmem:[#allocation11 + $0x58] sm:$0xff]  ;;  %v249_v37 = vld [vmem:[#allocation11 + $0x60] sm:$0xff]  ;;  %v250_v38 = vld [vmem:[#allocation11 + $0x68] sm:$0xff] }
  0x82   :  { %906 = vmatpush3.bf16.msra.mxu1 %v905_v18  ;;  %v237_v18 = vld [vmem:[#allocation11] sm:$0xff]  ;;  %v251_v40 = vld [vmem:[#allocation11 + $0x70] sm:$0xff]  ;;  %v252_v41 = vld [vmem:[#allocation11 + $0x78] sm:$0xff] }
  0x83   :  { %907 = vmatprep.subr.bf16.mxu1 %v1222_v1  ;;  %927 = vmatpush3.bf16.msra.mxu0 %v926_v39  ;;  %v983_v39 = vpack.c.bf16 %v250_v38, %v249_v37  ;;  %v667_v43 = vld [vmem:[%s1468_s5] ss:$0 sm:$0xff]  ;;  %s1223_s5 = smov [#allocation14]  }
  0x84   :  { %928 = vmatprep.subr.bf16.mxu0 %v1222_v1  ;;  %s637_s23 = sshll.u32 %s1223_s5, 4  ;;  %s638_s23 = int_to_ptr.vmem [resolvable:$true] %s637_s23 }
  0x85   :  { %s1134_s27 = scalar_lea.vmem %s638_s23, 128  ;;  %p1139_p7 = scmp.lt.s32.totalorder %s638_s23, %s638_s23 }
  0x86   :  { %909 = vmatpush3.bf16.msra.mxu1 %v908_v21  ;;  %v965_v21 = vpack.c.bf16 %v238_v19, %v237_v18  ;;  %p1135_p6 = scmp.ne.s32.totalorder %s638_s23, %s1134_s27  ;;  %p1140_p8 = scmp.lt.s32.totalorder %s1134_s27, %s1134_s27 }
  0x87   :  { %910 = vmatprep.subr.bf16.mxu1 %v1222_v1  ;;  %930 = vmatpush3.bf16.msra.mxu0 %v929_v42  ;;  %v986_v42 = vpack.c.bf16 %v252_v41, %v251_v40 }
  0x88   :  { %931 = vmatprep.subr.bf16.mxu0 %v1222_v1  ;;  %p1141_p9 = por %p1140_p8, %p1139_p7 }
  0x8a   :  { %912 = vmatpush3.bf16.msra.mxu1 %v911_v24  ;;  %v239_v24 = vld [vmem:[#allocation11 + $0x10] sm:$0xff]  ;;  %p1142_p10 = pnand %p1141_p9, %p1135_p6 }
  0x8b   :  { %913 = vmatprep.subr.bf16.mxu1 %v1222_v1  ;;  %933 = vmatpush3.bf16.msra.mxu0 %v932_v45 }
  0x8c   :  { %934 = vmatprep.subr.bf16.mxu0 %v1222_v1 }
  0x8e   :  { %915 = vmatpush3.bf16.msra.mxu1 %v914_v27  ;;  %v242_v27 = vld [vmem:[#allocation11 + $0x28] sm:$0xff] }
  0x8f   :  { %940 = vmatprep.subr.bf16.mxu1 %v1222_v1  ;;  %936 = vmatpush3.bf16.msra.mxu0 %v935_v48  ;;  %v971_v28 = vpack.c.bf16 %v242_v27, %v241_v26 }
  0x90   :  { %937 = vmatprep.subr.bf16.mxu0 %v1222_v1 }
  0x93   :  { %939 = vmatpush3.bf16.msra.mxu0 %v938_v17 }
  0x94   :  { %964 = vmatprep.subr.bf16.mxu0 %v1222_v1 }
 0x144   :  { %v184_v54 = vpop.f32.mrb[0].mxu0 }
 0x145   :  { %v746_v55 = vpop.f32.mrb[1].mxu0  ;;  %780 = vmatmul.mubr.f32.vlgmr.msra.gmra.mrb[0].mxu1 %v184_v54 }
 0x146   :  { %942 = vmatpush3.bf16.msra.mxu1 %v941_v51  ;;  %849 = vmatprep.mubr.msk.f32.mxu1 %vm1221_vm0, %v1220_v0 }
 0x147   :  { %943 = vmatprep.subr.bf16.mxu1 %v1222_v1 }
 0x14a   :  { %945 = vmatpush3.bf16.msra.mxu1 %v944_v56 }
 0x14b   :  { %946 = vmatprep.subr.bf16.mxu1 %v1222_v1 }
 0x14e   :  { %948 = vmatpush3.bf16.msra.mxu1 %v947_v59 }
 0x14f   :  { %949 = vmatprep.subr.bf16.mxu1 %v1222_v1 }
 0x152   :  { %951 = vmatpush3.bf16.msra.mxu1 %v950_v62 }
 0x153   :  { %952 = vmatprep.subr.bf16.mxu1 %v1222_v1 }
 0x156   :  { %954 = vmatpush3.bf16.msra.mxu1 %v953_v5 }
 0x157   :  { %955 = vmatprep.subr.bf16.mxu1 %v1222_v1 }
 0x15a   :  { %957 = vmatpush3.bf16.msra.mxu1 %v956_v8 }
 0x15b   :  { %958 = vmatprep.subr.bf16.mxu1 %v1222_v1 }
 0x15e   :  { %960 = vmatpush3.bf16.msra.mxu1 %v959_v11 }
 0x15f   :  { %961 = vmatprep.subr.bf16.mxu1 %v1222_v1 }
 0x162   :  { %963 = vmatpush3.bf16.msra.mxu1 %v962_v14 }
 0x163   :  { %887 = vmatprep.subr.mxu1 %v1220_v0 }
 0x165   :  { %850 = vmatmul.mubr.f32.vlgmr.msra.gmra.mrb[2].mxu1 %v1371_v2  ;;  %v968_v2 = vpack.c.bf16 %v240_v25, %v239_v24 }
 0x166   :  { %889 = vmatprep.mubr.msk.f32.mxu1 %vm1221_vm0, %v1220_v0 }
 0x218   :  { %v320_v20 = vpop.f32.mrb[0].mxu1 }
 0x219   :  { %v324_v22 = vmax.f32 %v320_v20, 0.0  ;;  %v781_v23 = vpop.f32.mrb[1].mxu1 }
 0x21b   :  { %549 = vst [vmem:[#allocation14] sm:$0xff] %v324_v22  ;;  %815 = vmatmul.mubr.f32.vlgmr.msra.gmra.mrb[2].mxu0 %v324_v22 }
 0x21c   :  { %966 = vmatpush3.bf16.msra.mxu0 %v965_v21  ;;  %884 = vmatprep.mubr.msk.f32.mxu0 %vm1221_vm0, %v1220_v0  ;;  %v247_v0 = vld [vmem:[#allocation11 + $0x50] sm:$0xff] }
 0x21d   :  { %967 = vmatprep.subr.bf16.mxu0 %v1222_v1  ;;  %v980_v36 = vpack.c.bf16 %v248_v35, %v247_v0 }
 0x220   :  { %969 = vmatpush3.bf16.msra.mxu0 %v968_v2 }
 0x221   :  { %970 = vmatprep.subr.bf16.mxu0 %v1222_v1 }
 0x224   :  { %972 = vmatpush3.bf16.msra.mxu0 %v971_v28 }
 0x225   :  { %973 = vmatprep.subr.bf16.mxu0 %v1222_v1 }
 0x228   :  { %975 = vmatpush3.bf16.msra.mxu0 %v974_v31 }
 0x229   :  { %976 = vmatprep.subr.bf16.mxu0 %v1222_v1 }
 0x22c   :  { %978 = vmatpush3.bf16.msra.mxu0 %v977_v34 }
 0x22d   :  { %979 = vmatprep.subr.bf16.mxu0 %v1222_v1 }
 0x230   :  { %981 = vmatpush3.bf16.msra.mxu0 %v980_v36 }
 0x231   :  { %982 = vmatprep.subr.bf16.mxu0 %v1222_v1 }
 0x234   :  { %984 = vmatpush3.bf16.msra.mxu0 %v983_v39 }
 0x235   :  { %985 = vmatprep.subr.bf16.mxu0 %v1222_v1  ;;  %v668_v1 = vld [vmem:[%s1470_s7] ss:$0 sm:$0xff] }
 0x238   :  { %v467_v44 = vpop.f32.mrb[2].mxu1  ;;  %987 = vmatpush3.bf16.msra.mxu0 %v986_v42 }
 0x239   :  { %v468_v45 = vadd.f32 %v667_v43, %v467_v44  ;;  %v851_v46 = vpop.f32.mrb[3].mxu1 }
 0x23b   :  { %v471_v47 = vmax.f32 %v468_v45, 0.0 }
 0x23d   :  { %885 = vmatmul.mubr.f32.vlgmr.msra.gmra.mrb[4].mxu0 %v471_v47 }
 0x2ee   :  { %v391_v48 = vpop.f32.mrb[2].mxu0 }
 0x2ef   :  { %v816_v49 = vpop.f32.mrb[3].mxu0  ;;  %888 = vmatpush3.msra.mxu1 %v391_v48 }
 0x2f0   :  { %890 = vmatmul.mubr.msk.f32.vlgmr.msra.gmra.mrb[4].mxu1 %vm114_vm1, %v1373_v3 }
 0x310   :  { %v544_v50 = vpop.f32.mrb[4].mxu0 }
 0x311   :  { %v545_v51 = vadd.f32 %v668_v1, %v544_v50  ;;  %v886_v52 = vpop.f32.mrb[5].mxu0 }
 0x313   :  { %548 = vst [vmem:[#allocation13] sm:$0xff] %v545_v51 }
 0x314   :  { %1145 = shalt.err (!%p1142_p10)
}
 0x315   :  { %s1146_s7 = scalar_lea.hbm %s1472_s9, 128 }
 0x316   :  { %p1147_p11 = scmp.ne.s32.totalorder %s1472_s9, %s1146_s7  ;;  %p1150_p12 = scmp.lt.u32.totalorder %s1146_s7, %s1472_s9 }
 0x318   :  { %p1152_p13 = pnand %p1150_p12, %p1147_p11 }
 0x31a   :  { %1155 = shalt.err (!%p1152_p13)
}
 0x31b   :  { %640 = dma.vmem_to_hbm [thread:$0]  %s638_s23, 128, %s1472_s9, [#allocation15]  }
 0x31c   :  { %s1156_s16 = scalar_lea.vmem %s628_s25, 128  ;;  %p1161_p1 = scmp.lt.s32.totalorder %s628_s25, %s628_s25 }
 0x31d   :  { %p1157_p0 = scmp.ne.s32.totalorder %s628_s25, %s1156_s16  ;;  %p1162_p2 = scmp.lt.s32.totalorder %s1156_s16, %s1156_s16 }
 0x31f   :  { %p1163_p3 = por %p1162_p2, %p1161_p1 }
 0x321   :  { %p1164_p4 = pnand %p1163_p3, %p1157_p0 }
 0x323   :  { %1167 = shalt.err (!%p1164_p4)
}
 0x324   :  { %s1168_s19 = scalar_lea.hbm %s1471_s8, 128 }
 0x325   :  { %p1169_p5 = scmp.ne.s32.totalorder %s1471_s8, %s1168_s19  ;;  %p1172_p6 = scmp.lt.u32.totalorder %s1168_s19, %s1471_s8 }
 0x327   :  { %p1174_p7 = pnand %p1172_p6, %p1169_p5 }
 0x329   :  { %1177 = shalt.err (!%p1174_p7)
}
 0x32a   :  { %630 = dma.vmem_to_hbm [thread:$0]  %s628_s25, 128, %s1471_s8, [#allocation4]  }
 0x32b   :  { %s1225_s13 = smov [#allocation16]  }
 0x32c   :  { %s647_s6 = sshll.u32 %s1225_s13, 4  ;;  %s648_s6 = int_to_ptr.vmem [resolvable:$true] %s647_s6 }
 0x32d   :  { %s1178_s14 = scalar_lea.vmem %s648_s6, 128  ;;  %p1183_p9 = scmp.lt.s32.totalorder %s648_s6, %s648_s6 }
 0x32e   :  { %p1179_p8 = scmp.ne.s32.totalorder %s648_s6, %s1178_s14  ;;  %p1184_p10 = scmp.lt.s32.totalorder %s1178_s14, %s1178_s14 }
 0x330   :  { %p1185_p11 = por %p1184_p10, %p1183_p9 }
 0x332   :  { %p1186_p12 = pnand %p1185_p11, %p1179_p8 }
 0x3c3   :  { %v616_v3 = vpop.f32.mrb[4].mxu1 }
 0x3c4   :  { %620 = vst [vmem:[#allocation16] sm:$0xff] %v616_v3  ;;  %v891_v53 = vpop.f32.mrb[5].mxu1 }
 0x3c5   :  { %1189 = shalt.err (!%p1186_p12)
}
 0x3c6   :  { %s1190_s5 = scalar_lea.hbm %s1473_s10, 128 }
 0x3c7   :  { %p1191_p13 = scmp.ne.s32.totalorder %s1473_s10, %s1190_s5  ;;  %p1194_p0 = scmp.lt.u32.totalorder %s1190_s5, %s1473_s10 }
 0x3c9   :  { %p1196_p1 = pnand %p1194_p0, %p1191_p13 }
 0x3cb   :  { %1199 = shalt.err (!%p1196_p1)
}
 0x3cc   :  { %650 = dma.vmem_to_hbm [thread:$0]  %s648_s6, 128, %s1473_s10, [#allocation15]  }
 0x3cd   :  { %1208 = dma.done.wait [#allocation4], 128  }
 0x3ce   :  { %1209 = vsyncadd [#allocation4], 4294967168 }
 0x3cf   :  { %1210 = dma.done.wait [#allocation15], 256  }
 0x3d0   :  { %1211 = vsyncadd [#allocation15], 4294967040 }
 0x3d1   :  { %660 = vsyncpa [#allocation3], 1 }
 0x3d2   :  { %661 = vsyncpa [#allocation6], 1 }
 0x3d3   :  { %662 = vsyncpa [#allocation9], 1 }
 0x3d4   :  { %663 = vsyncpa [#allocation12], 1 }
 0x3d5   :  { %664 = vsyncpa [#allocation4], 1 }
 0x3d6   :  { %665 = vsyncpa [#allocation15], 1 }

// kernel: tpu_custom_call.1
= control target key start
LH: loop header
LB: loop body
LE: loop exit
PB: predicated region body
PF: predicated region fallthrough
CT: control target
= control target key end

     0   :  { %16 = vsyncpa [#allocation3], 0  ;;  %s1463_s0 = inlined_call_operand.hbm [shape: f32[8,8], index: 0, kind: input, shape index: {}]   ;;  %s1464_s1 = inlined_call_operand.hbm [shape: f32[8,128], index: 1, kind: input, shape index: {}]   ;;  %s1465_s2 = inlined_call_operand.hbm [shape: f32[128,128], index: 2, kind: input, shape index: {}]   ;;  %s1466_s3 = inlined_call_operand.hbm [shape: f32[128,128], index: 3, kind: input, shape index: {}]   ;;  %s1467_s4 = inlined_call_operand.hbm [shape: f32[128,128], index: 4, kind: input, shape index: {}]   ;;  %s1468_s5 = inlined_call_operand.vmem [shape: f32[1,128], index: 5, kind: input, shape index: {}]   ;;  %s1469_s6 = inlined_call_operand.hbm [shape: f32[128,128], index: 6, kind: input, shape index: {}]   ;;  %s1470_s7 = inlined_call_operand.vmem [shape: f32[1,128], index: 7, kind: input, shape index: {}]   ;;  %s1471_s8 = inlined_call_operand.hbm [shape: f32[8,128], index: 8, kind: output, shape index: {0}]   ;;  %s1472_s9 = inlined_call_operand.hbm [shape: f32[8,128], index: 9, kind: output, shape index: {1}]   ;;  %s1473_s10 = inlined_call_operand.hbm [shape: f32[8,128], index: 10, kind: output, shape index: {2}]  }
   0x1   :  { %17 = vsyncpa [#allocation6], 0 }
   0x2   :  { %18 = vsyncpa [#allocation9], 0 }
   0x3   :  { %19 = vsyncpa [#allocation12], 0 }
   0x4   :  { %20 = vsyncpa [#allocation4], 0 }
   0x5   :  { %21 = vsyncpa [#allocation15], 0  ;;  %s1212_s13 = smov [#allocation5]   ;;  %s1002_s17 = scalar_lea.hbm %s1464_s1, 128 }
   0x6   :  { %s38_s14 = sshll.u32 %s1212_s13, 4  ;;  %p1003_p0 = scmp.ne.s32.totalorder %s1464_s1, %s1002_s17  ;;  %s39_s14 = int_to_ptr.vmem [resolvable:$true] %s38_s14 }
   0x7   :  { %p1006_p1 = scmp.lt.u32.totalorder %s1002_s17, %s1464_s1 }
   0x9   :  { %p1008_p2 = pnand %p1006_p1, %p1003_p0 }
   0xb   :  { %1011 = shalt.err (!%p1008_p2)
}
   0xc   :  { %s1012_s22 = scalar_lea.vmem %s39_s14, 128  ;;  %p1017_p4 = scmp.lt.s32.totalorder %s39_s14, %s39_s14 }
   0xd   :  { %p1013_p3 = scmp.ne.s32.totalorder %s39_s14, %s1012_s22  ;;  %p1018_p5 = scmp.lt.s32.totalorder %s1012_s22, %s1012_s22 }
   0xf   :  { %p1019_p6 = por %p1018_p5, %p1017_p4 }
  0x11   :  { %p1020_p7 = pnand %p1019_p6, %p1013_p3 }
  0x13   :  { %1023 = shalt.err (!%p1020_p7)
}
  0x14   :  { %41 = dma.hbm_to_vmem [thread:$0]  %s1464_s1, 128, %s39_s14, [#allocation6]  }
  0x15   :  { %s1213_s25 = smov [#allocation8]   ;;  %s1214_s27 = smov [#allocation2]  }
  0x16   :  { %s59_s26 = sshll.u32 %s1213_s25, 4  ;;  %s28_s28 = sshll.u32 %s1214_s27, 4  ;;  %s60_s26 = int_to_ptr.vmem [resolvable:$true] %s59_s26  ;;  %s29_s28 = int_to_ptr.vmem [resolvable:$true] %s28_s28 }
  0x17   :  { %s1024_s11 = scalar_lea.hbm %s1466_s3, 2048 }
  0x18   :  { %p1025_p8 = scmp.ne.s32.totalorder %s1466_s3, %s1024_s11  ;;  %p1028_p9 = scmp.lt.u32.totalorder %s1024_s11, %s1466_s3 }
  0x1a   :  { %p1030_p10 = pnand %p1028_p9, %p1025_p8 }
  0x1c   :  { %1033 = shalt.err (!%p1030_p10)
}
  0x1d   :  { %s1034_s1 = scalar_lea.vmem %s60_s26, 2048  ;;  %p1039_p12 = scmp.lt.s32.totalorder %s60_s26, %s60_s26 }
  0x1e   :  { %p1035_p11 = scmp.ne.s32.totalorder %s60_s26, %s1034_s1  ;;  %p1040_p13 = scmp.lt.s32.totalorder %s1034_s1, %s1034_s1 }
  0x20   :  { %p1041_p0 = por %p1040_p13, %p1039_p12 }
  0x22   :  { %p1042_p1 = pnand %p1041_p0, %p1035_p11 }
  0x24   :  { %1045 = shalt.err (!%p1042_p1)
}
  0x25   :  { %s1215_s14 = smov 128   ;;  %s1216_s17 = smov 8  }
  0x26   :  { %65 = dma.hbm_to_vmem [thread:$0]  %s1466_s3, 2048, %s60_s26, [#allocation9], %s1215_s14, %s1215_s14, %s1216_s17  }
  0x27   :  { %s1046_s22 = scalar_lea.hbm %s1463_s0, 128 }
  0x28   :  { %p1047_p2 = scmp.ne.s32.totalorder %s1463_s0, %s1046_s22  ;;  %p1050_p3 = scmp.lt.u32.totalorder %s1046_s22, %s1463_s0 }
  0x2a   :  { %p1052_p4 = pnand %p1050_p3, %p1047_p2 }
  0x2c   :  { %1055 = shalt.err (!%p1052_p4)
}
  0x2d   :  { %s1056_s29 = scalar_lea.vmem %s29_s28, 128  ;;  %p1061_p6 = scmp.lt.s32.totalorder %s29_s28, %s29_s28 }
  0x2e   :  { %p1057_p5 = scmp.ne.s32.totalorder %s29_s28, %s1056_s29  ;;  %p1062_p7 = scmp.lt.s32.totalorder %s1056_s29, %s1056_s29 }
  0x30   :  { %p1063_p8 = por %p1062_p7, %p1061_p6 }
  0x32   :  { %p1064_p9 = pnand %p1063_p8, %p1057_p5 }
  0x34   :  { %1067 = shalt.err (!%p1064_p9)
}
  0x35   :  { %31 = dma.hbm_to_vmem [thread:$0]  %s1463_s0, 128, %s29_s28, [#allocation3]  }
  0x36   :  { %s1217_s30 = smov [#allocation7]   ;;  %s1218_s12 = smov [#allocation10]  }
  0x37   :  { %s47_s11 = sshll.u32 %s1217_s30, 4  ;;  %s71_s13 = sshll.u32 %s1218_s12, 4  ;;  %s48_s11 = int_to_ptr.vmem [resolvable:$true] %s47_s11  ;;  %s72_s13 = int_to_ptr.vmem [resolvable:$true] %s71_s13 }
  0x38   :  { %s1068_s1 = scalar_lea.hbm %s1465_s2, 2048 }
  0x39   :  { %p1069_p10 = scmp.ne.s32.totalorder %s1465_s2, %s1068_s1  ;;  %p1072_p11 = scmp.lt.u32.totalorder %s1068_s1, %s1465_s2 }
  0x3b   :  { %p1074_p12 = pnand %p1072_p11, %p1069_p10 }
  0x3d   :  { %1077 = shalt.err (!%p1074_p12)
}
  0x3e   :  { %s1078_s0 = scalar_lea.vmem %s48_s11, 2048  ;;  %p1083_p0 = scmp.lt.s32.totalorder %s48_s11, %s48_s11 }
  0x3f   :  { %p1079_p13 = scmp.ne.s32.totalorder %s48_s11, %s1078_s0  ;;  %p1084_p1 = scmp.lt.s32.totalorder %s1078_s0, %s1078_s0 }
  0x41   :  { %p1085_p2 = por %p1084_p1, %p1083_p0 }
  0x43   :  { %p1086_p3 = pnand %p1085_p2, %p1079_p13 }
  0x45   :  { %1089 = shalt.err (!%p1086_p3)
}
  0x46   :  { %53 = dma.hbm_to_vmem [thread:$0]  %s1465_s2, 2048, %s48_s11, [#allocation6], %s1215_s14, %s1215_s14, %s1216_s17  }
  0x47   :  { %s1090_s25 = scalar_lea.hbm %s1467_s4, 2048 }
  0x48   :  { %p1091_p4 = scmp.ne.s32.totalorder %s1467_s4, %s1090_s25  ;;  %p1094_p5 = scmp.lt.u32.totalorder %s1090_s25, %s1467_s4 }
  0x4a   :  { %p1096_p6 = pnand %p1094_p5, %p1091_p4 }
  0x4c   :  { %1099 = shalt.err (!%p1096_p6)
}
  0x4d   :  { %s1100_s30 = scalar_lea.vmem %s72_s13, 2048  ;;  %p1105_p8 = scmp.lt.s32.totalorder %s72_s13, %s72_s13 }
  0x4e   :  { %p1101_p7 = scmp.ne.s32.totalorder %s72_s13, %s1100_s30  ;;  %p1106_p9 = scmp.lt.s32.totalorder %s1100_s30, %s1100_s30 }
  0x50   :  { %p1107_p10 = por %p1106_p9, %p1105_p8 }
  0x52   :  { %p1108_p11 = pnand %p1107_p10, %p1101_p7 }
  0x54   :  { %1111 = shalt.err (!%p1108_p11)
}
  0x55   :  { %77 = dma.hbm_to_vmem [thread:$0]  %s1467_s4, 2048, %s72_s13, [#allocation9], %s1215_s14, %s1215_s14, %s1216_s17  }
  0x56   :  { %s1219_s12 = smov [#allocation11]   ;;  %s1112_s18 = scalar_lea.hbm %s1469_s6, 2048 }
  0x57   :  { %s85_s15 = sshll.u32 %s1219_s12, 4  ;;  %p1113_p12 = scmp.ne.s32.totalorder %s1469_s6, %s1112_s18  ;;  %s86_s15 = int_to_ptr.vmem [resolvable:$true] %s85_s15 }
  0x58   :  { %p1116_p13 = scmp.lt.u32.totalorder %s1112_s18, %s1469_s6 }
  0x5a   :  { %p1118_p0 = pnand %p1116_p13, %p1113_p12 }
  0x5c   :  { %1121 = shalt.err (!%p1118_p0)
}
  0x5d   :  { %s1122_s28 = scalar_lea.vmem %s86_s15, 2048  ;;  %p1127_p2 = scmp.lt.s32.totalorder %s86_s15, %s86_s15 }
  0x5e   :  { %p1123_p1 = scmp.ne.s32.totalorder %s86_s15, %s1122_s28  ;;  %p1128_p3 = scmp.lt.s32.totalorder %s1122_s28, %s1122_s28 }
  0x60   :  { %p1129_p4 = por %p1128_p3, %p1127_p2 }
  0x62   :  { %p1130_p5 = pnand %p1129_p4, %p1123_p1 }
  0x64   :  { %1133 = shalt.err (!%p1130_p5)
}
  0x65   :  { %91 = dma.hbm_to_vmem [thread:$0]  %s1469_s6, 2048, %s86_s15, [#allocation12], %s1215_s14, %s1215_s14, %s1216_s17  }
  0x66   :  { %1200 = dma.done.wait [#allocation3], 128  }
  0x67   :  { %1201 = vsyncadd [#allocation3], 4294967168 }
  0x68   :  { %1202 = dma.done.wait [#allocation6], 2176  }
  0x69   :  { %1203 = vsyncadd [#allocation6], 4294965120 }
  0x6a   :  { %1204 = dma.done.wait [#allocation9], 4096  }
  0x6b   :  { %1205 = vsyncadd [#allocation9], 4294963200 }
  0x6c   :  { %1206 = dma.done.wait [#allocation12], 2048  }
  0x6d   :  { %1207 = vsyncadd [#allocation12], 4294965248  ;;  %v1220_v0 = vmov 0.0   ;;  %vm1221_vm0 = vmmov 0   ;;  %v1222_v1 = vmov 0.0|0.0   ;;  %vm114_vm1 = vcmask 64512  }
  0x6e   :  { %742 = vmatprep.subr.mxu0 %v1220_v0  ;;  %744 = vmatprep.mubr.msk.f32.mxu0 %vm1221_vm0, %v1220_v0  ;;  %v1371_v2 = vld [vmem:[#allocation5] sm:$0xff]  ;;  %v1373_v3 = vld [vmem:[#allocation2] sm:$0xff]  ;;  %v188_v4 = vld [vmem:[#allocation7] sm:$0xff]  ;;  %s1224_s24 = smov [#allocation13]  }
  0x6f   :  { %892 = vmatprep.subr.bf16.mxu1 %v1222_v1  ;;  %779 = vmatprep.mubr.msk.f32.mxu1 %vm1221_vm0, %v1220_v0  ;;  %v189_v5 = vld [vmem:[#allocation7 + $0x8] sm:$0xff]  ;;  %v190_v6 = vld [vmem:[#allocation7 + $0x10] sm:$0xff]  ;;  %v191_v7 = vld [vmem:[#allocation7 + $0x18] sm:$0xff]  ;;  %s627_s25 = sshll.u32 %s1224_s24, 4  ;;  %s628_s25 = int_to_ptr.vmem [resolvable:$true] %s627_s25 }
  0x70   :  { %743 = vmatpush3.msra.mxu0 %v1371_v2  ;;  %v893_v8 = vpack.c.bf16 %v189_v5, %v188_v4  ;;  %v896_v9 = vpack.c.bf16 %v191_v7, %v190_v6  ;;  %v192_v10 = vld [vmem:[#allocation7 + $0x20] sm:$0xff]  ;;  %v193_v11 = vld [vmem:[#allocation7 + $0x28] sm:$0xff]  ;;  %v194_v13 = vld [vmem:[#allocation7 + $0x30] sm:$0xff] }
  0x71   :  { %745 = vmatmul.mubr.msk.f32.vlgmr.msra.gmra.mrb[0].mxu0 %vm114_vm1, %v1373_v3  ;;  %916 = vmatprep.subr.bf16.mxu0 %v1222_v1  ;;  %v899_v12 = vpack.c.bf16 %v193_v11, %v192_v10  ;;  %v195_v14 = vld [vmem:[#allocation7 + $0x38] sm:$0xff]  ;;  %v196_v16 = vld [vmem:[#allocation7 + $0x40] sm:$0xff]  ;;  %v197_v17 = vld [vmem:[#allocation7 + $0x48] sm:$0xff] }
  0x72   :  { %814 = vmatprep.mubr.msk.f32.mxu0 %vm1221_vm0, %v1220_v0  ;;  %894 = vmatpush3.bf16.msra.mxu1 %v893_v8  ;;  %v902_v15 = vpack.c.bf16 %v195_v14, %v194_v13  ;;  %v905_v18 = vpack.c.bf16 %v197_v17, %v196_v16  ;;  %v198_v19 = vld [vmem:[#allocation7 + $0x50] sm:$0xff]  ;;  %v199_v20 = vld [vmem:[#allocation7 + $0x58] sm:$0xff]  ;;  %v200_v22 = vld [vmem:[#allocation7 + $0x60] sm:$0xff] }
  0x73   :  { %895 = vmatprep.subr.bf16.mxu1 %v1222_v1  ;;  %v908_v21 = vpack.c.bf16 %v199_v20, %v198_v19  ;;  %v201_v23 = vld [vmem:[#allocation7 + $0x68] sm:$0xff]  ;;  %v202_v25 = vld [vmem:[#allocation7 + $0x70] sm:$0xff]  ;;  %v203_v26 = vld [vmem:[#allocation7 + $0x78] sm:$0xff] }
  0x74   :  { %v911_v24 = vpack.c.bf16 %v201_v23, %v200_v22  ;;  %v914_v27 = vpack.c.bf16 %v203_v26, %v202_v25  ;;  %v204_v28 = vld [vmem:[#allocation8] sm:$0xff]  ;;  %v205_v29 = vld [vmem:[#allocation8 + $0x8] sm:$0xff]  ;;  %v206_v31 = vld [vmem:[#allocation8 + $0x10] sm:$0xff] }
  0x75   :  { %v917_v30 = vpack.c.bf16 %v205_v29, %v204_v28  ;;  %v207_v32 = vld [vmem:[#allocation8 + $0x18] sm:$0xff]  ;;  %v208_v34 = vld [vmem:[#allocation8 + $0x20] sm:$0xff]  ;;  %v209_v35 = vld [vmem:[#allocation8 + $0x28] sm:$0xff] }
  0x76   :  { %897 = vmatpush3.bf16.msra.mxu1 %v896_v9  ;;  %v920_v33 = vpack.c.bf16 %v207_v32, %v206_v31  ;;  %v923_v36 = vpack.c.bf16 %v209_v35, %v208_v34  ;;  %v210_v37 = vld [vmem:[#allocation8 + $0x30] sm:$0xff]  ;;  %v211_v38 = vld [vmem:[#allocation8 + $0x38] sm:$0xff]  ;;  %v212_v40 = vld [vmem:[#allocation8 + $0x40] sm:$0xff] }
  0x77   :  { %898 = vmatprep.subr.bf16.mxu1 %v1222_v1  ;;  %918 = vmatpush3.bf16.msra.mxu0 %v917_v30  ;;  %v926_v39 = vpack.c.bf16 %v211_v38, %v210_v37  ;;  %v213_v41 = vld [vmem:[#allocation8 + $0x48] sm:$0xff]  ;;  %v214_v43 = vld [vmem:[#allocation8 + $0x50] sm:$0xff]  ;;  %v215_v44 = vld [vmem:[#allocation8 + $0x58] sm:$0xff] }
  0x78   :  { %919 = vmatprep.subr.bf16.mxu0 %v1222_v1  ;;  %v929_v42 = vpack.c.bf16 %v213_v41, %v212_v40  ;;  %v932_v45 = vpack.c.bf16 %v215_v44, %v214_v43  ;;  %v216_v46 = vld [vmem:[#allocation8 + $0x60] sm:$0xff]  ;;  %v217_v47 = vld [vmem:[#allocation8 + $0x68] sm:$0xff]  ;;  %v222_v52 = vld [vmem:[#allocation10 + $0x10] sm:$0xff] }
  0x79   :  { %v935_v48 = vpack.c.bf16 %v217_v47, %v216_v46  ;;  %v220_v49 = vld [vmem:[#allocation10] sm:$0xff]  ;;  %v221_v50 = vld [vmem:[#allocation10 + $0x8] sm:$0xff]  ;;  %v223_v53 = vld [vmem:[#allocation10 + $0x18] sm:$0xff] }
  0x7a   :  { %900 = vmatpush3.bf16.msra.mxu1 %v899_v12  ;;  %v941_v51 = vpack.c.bf16 %v221_v50, %v220_v49  ;;  %v944_v56 = vpack.c.bf16 %v223_v53, %v222_v52  ;;  %v224_v57 = vld [vmem:[#allocation10 + $0x20] sm:$0xff]  ;;  %v225_v58 = vld [vmem:[#allocation10 + $0x28] sm:$0xff]  ;;  %v226_v60 = vld [vmem:[#allocation10 + $0x30] sm:$0xff] }
  0x7b   :  { %901 = vmatprep.subr.bf16.mxu1 %v1222_v1  ;;  %921 = vmatpush3.bf16.msra.mxu0 %v920_v33  ;;  %v947_v59 = vpack.c.bf16 %v225_v58, %v224_v57  ;;  %v227_v61 = vld [vmem:[#allocation10 + $0x38] sm:$0xff]  ;;  %v228_v63 = vld [vmem:[#allocation10 + $0x40] sm:$0xff]  ;;  %v229_v4 = vld [vmem:[#allocation10 + $0x48] sm:$0xff] }
  0x7c   :  { %922 = vmatprep.subr.bf16.mxu0 %v1222_v1  ;;  %v950_v62 = vpack.c.bf16 %v227_v61, %v226_v60  ;;  %v953_v5 = vpack.c.bf16 %v229_v4, %v228_v63  ;;  %v230_v6 = vld [vmem:[#allocation10 + $0x50] sm:$0xff]  ;;  %v231_v7 = vld [vmem:[#allocation10 + $0x58] sm:$0xff]  ;;  %v232_v9 = vld [vmem:[#allocation10 + $0x60] sm:$0xff] }
  0x7d   :  { %v956_v8 = vpack.c.bf16 %v231_v7, %v230_v6  ;;  %v233_v10 = vld [vmem:[#allocation10 + $0x68] sm:$0xff]  ;;  %v234_v12 = vld [vmem:[#allocation10 + $0x70] sm:$0xff]  ;;  %v235_v13 = vld [vmem:[#allocation10 + $0x78] sm:$0xff] }
  0x7e   :  { %903 = vmatpush3.bf16.msra.mxu1 %v902_v15  ;;  %v959_v11 = vpack.c.bf16 %v233_v10, %v232_v9  ;;  %v962_v14 = vpack.c.bf16 %v235_v13, %v234_v12  ;;  %v218_v15 = vld [vmem:[#allocation8 + $0x70] sm:$0xff]  ;;  %v219_v16 = vld [vmem:[#allocation8 + $0x78] sm:$0xff]  ;;  %v238_v19 = vld [vmem:[#allocation11 + $0x8] sm:$0xff] }
  0x7f   :  { %904 = vmatprep.subr.bf16.mxu1 %v1222_v1  ;;  %924 = vmatpush3.bf16.msra.mxu0 %v923_v36  ;;  %v938_v17 = vpack.c.bf16 %v219_v16, %v218_v15  ;;  %v240_v25 = vld [vmem:[#allocation11 + $0x18] sm:$0xff]  ;;  %v241_v26 = vld [vmem:[#allocation11 + $0x20] sm:$0xff]  ;;  %v243_v29 = vld [vmem:[#allocation11 + $0x30] sm:$0xff] }
  0x80   :  { %925 = vmatprep.subr.bf16.mxu0 %v1222_v1  ;;  %v244_v30 = vld [vmem:[#allocation11 + $0x38] sm:$0xff]  ;;  %v245_v32 = vld [vmem:[#allocation11 + $0x40] sm:$0xff]  ;;  %v246_v33 = vld [vmem:[#allocation11 + $0x48] sm:$0xff] }
  0x81   :  { %v974_v31 = vpack.c.bf16 %v244_v30, %v243_v29  ;;  %v977_v34 = vpack.c.bf16 %v246_v33, %v245_v32  ;;  %v248_v35 = vld [vmem:[#allocation11 + $0x58] sm:$0xff]  ;;  %v249_v37 = vld [vmem:[#allocation11 + $0x60] sm:$0xff]  ;;  %v250_v38 = vld [vmem:[#allocation11 + $0x68] sm:$0xff] }
  0x82   :  { %906 = vmatpush3.bf16.msra.mxu1 %v905_v18  ;;  %v237_v18 = vld [vmem:[#allocation11] sm:$0xff]  ;;  %v251_v40 = vld [vmem:[#allocation11 + $0x70] sm:$0xff]  ;;  %v252_v41 = vld [vmem:[#allocation11 + $0x78] sm:$0xff] }
  0x83   :  { %907 = vmatprep.subr.bf16.mxu1 %v1222_v1  ;;  %927 = vmatpush3.bf16.msra.mxu0 %v926_v39  ;;  %v983_v39 = vpack.c.bf16 %v250_v38, %v249_v37  ;;  %v667_v43 = vld [vmem:[%s1468_s5] ss:$0 sm:$0xff]  ;;  %s1223_s5 = smov [#allocation14]  }
  0x84   :  { %928 = vmatprep.subr.bf16.mxu0 %v1222_v1  ;;  %s637_s23 = sshll.u32 %s1223_s5, 4  ;;  %s638_s23 = int_to_ptr.vmem [resolvable:$true] %s637_s23 }
  0x85   :  { %s1134_s27 = scalar_lea.vmem %s638_s23, 128  ;;  %p1139_p7 = scmp.lt.s32.totalorder %s638_s23, %s638_s23 }
  0x86   :  { %909 = vmatpush3.bf16.msra.mxu1 %v908_v21  ;;  %v965_v21 = vpack.c.bf16 %v238_v19, %v237_v18  ;;  %p1135_p6 = scmp.ne.s32.totalorder %s638_s23, %s1134_s27  ;;  %p1140_p8 = scmp.lt.s32.totalorder %s1134_s27, %s1134_s27 }
  0x87   :  { %910 = vmatprep.subr.bf16.mxu1 %v1222_v1  ;;  %930 = vmatpush3.bf16.msra.mxu0 %v929_v42  ;;  %v986_v42 = vpack.c.bf16 %v252_v41, %v251_v40 }
  0x88   :  { %931 = vmatprep.subr.bf16.mxu0 %v1222_v1  ;;  %p1141_p9 = por %p1140_p8, %p1139_p7 }
  0x8a   :  { %912 = vmatpush3.bf16.msra.mxu1 %v911_v24  ;;  %v239_v24 = vld [vmem:[#allocation11 + $0x10] sm:$0xff]  ;;  %p1142_p10 = pnand %p1141_p9, %p1135_p6 }
  0x8b   :  { %913 = vmatprep.subr.bf16.mxu1 %v1222_v1  ;;  %933 = vmatpush3.bf16.msra.mxu0 %v932_v45 }
  0x8c   :  { %934 = vmatprep.subr.bf16.mxu0 %v1222_v1 }
  0x8e   :  { %915 = vmatpush3.bf16.msra.mxu1 %v914_v27  ;;  %v242_v27 = vld [vmem:[#allocation11 + $0x28] sm:$0xff] }
  0x8f   :  { %940 = vmatprep.subr.bf16.mxu1 %v1222_v1  ;;  %936 = vmatpush3.bf16.msra.mxu0 %v935_v48  ;;  %v971_v28 = vpack.c.bf16 %v242_v27, %v241_v26 }
  0x90   :  { %937 = vmatprep.subr.bf16.mxu0 %v1222_v1 }
  0x93   :  { %939 = vmatpush3.bf16.msra.mxu0 %v938_v17 }
  0x94   :  { %964 = vmatprep.subr.bf16.mxu0 %v1222_v1 }
 0x144   :  { %v184_v54 = vpop.f32.mrb[0].mxu0 }
 0x145   :  { %v746_v55 = vpop.f32.mrb[1].mxu0  ;;  %780 = vmatmul.mubr.f32.vlgmr.msra.gmra.mrb[0].mxu1 %v184_v54 }
 0x146   :  { %942 = vmatpush3.bf16.msra.mxu1 %v941_v51  ;;  %849 = vmatprep.mubr.msk.f32.mxu1 %vm1221_vm0, %v1220_v0 }
 0x147   :  { %943 = vmatprep.subr.bf16.mxu1 %v1222_v1 }
 0x14a   :  { %945 = vmatpush3.bf16.msra.mxu1 %v944_v56 }
 0x14b   :  { %946 = vmatprep.subr.bf16.mxu1 %v1222_v1 }
 0x14e   :  { %948 = vmatpush3.bf16.msra.mxu1 %v947_v59 }
 0x14f   :  { %949 = vmatprep.subr.bf16.mxu1 %v1222_v1 }
 0x152   :  { %951 = vmatpush3.bf16.msra.mxu1 %v950_v62 }
 0x153   :  { %952 = vmatprep.subr.bf16.mxu1 %v1222_v1 }
 0x156   :  { %954 = vmatpush3.bf16.msra.mxu1 %v953_v5 }
 0x157   :  { %955 = vmatprep.subr.bf16.mxu1 %v1222_v1 }
 0x15a   :  { %957 = vmatpush3.bf16.msra.mxu1 %v956_v8 }
 0x15b   :  { %958 = vmatprep.subr.bf16.mxu1 %v1222_v1 }
 0x15e   :  { %960 = vmatpush3.bf16.msra.mxu1 %v959_v11 }
 0x15f   :  { %961 = vmatprep.subr.bf16.mxu1 %v1222_v1 }
 0x162   :  { %963 = vmatpush3.bf16.msra.mxu1 %v962_v14 }
 0x163   :  { %887 = vmatprep.subr.mxu1 %v1220_v0 }
 0x165   :  { %850 = vmatmul.mubr.f32.vlgmr.msra.gmra.mrb[2].mxu1 %v1371_v2  ;;  %v968_v2 = vpack.c.bf16 %v240_v25, %v239_v24 }
 0x166   :  { %889 = vmatprep.mubr.msk.f32.mxu1 %vm1221_vm0, %v1220_v0 }
 0x218   :  { %v320_v20 = vpop.f32.mrb[0].mxu1 }
 0x219   :  { %v324_v22 = vmax.f32 %v320_v20, 0.0  ;;  %v781_v23 = vpop.f32.mrb[1].mxu1 }
 0x21b   :  { %549 = vst [vmem:[#allocation14] sm:$0xff] %v324_v22  ;;  %815 = vmatmul.mubr.f32.vlgmr.msra.gmra.mrb[2].mxu0 %v324_v22 }
 0x21c   :  { %966 = vmatpush3.bf16.msra.mxu0 %v965_v21  ;;  %884 = vmatprep.mubr.msk.f32.mxu0 %vm1221_vm0, %v1220_v0  ;;  %v247_v0 = vld [vmem:[#allocation11 + $0x50] sm:$0xff] }
 0x21d   :  { %967 = vmatprep.subr.bf16.mxu0 %v1222_v1  ;;  %v980_v36 = vpack.c.bf16 %v248_v35, %v247_v0 }
 0x220   :  { %969 = vmatpush3.bf16.msra.mxu0 %v968_v2 }
 0x221   :  { %970 = vmatprep.subr.bf16.mxu0 %v1222_v1 }
 0x224   :  { %972 = vmatpush3.bf16.msra.mxu0 %v971_v28 }
 0x225   :  { %973 = vmatprep.subr.bf16.mxu0 %v1222_v1 }
 0x228   :  { %975 = vmatpush3.bf16.msra.mxu0 %v974_v31 }
 0x229   :  { %976 = vmatprep.subr.bf16.mxu0 %v1222_v1 }
 0x22c   :  { %978 = vmatpush3.bf16.msra.mxu0 %v977_v34 }
 0x22d   :  { %979 = vmatprep.subr.bf16.mxu0 %v1222_v1 }
 0x230   :  { %981 = vmatpush3.bf16.msra.mxu0 %v980_v36 }
 0x231   :  { %982 = vmatprep.subr.bf16.mxu0 %v1222_v1 }
 0x234   :  { %984 = vmatpush3.bf16.msra.mxu0 %v983_v39 }
 0x235   :  { %985 = vmatprep.subr.bf16.mxu0 %v1222_v1  ;;  %v668_v1 = vld [vmem:[%s1470_s7] ss:$0 sm:$0xff] }
 0x238   :  { %v467_v44 = vpop.f32.mrb[2].mxu1  ;;  %987 = vmatpush3.bf16.msra.mxu0 %v986_v42 }
 0x239   :  { %v468_v45 = vadd.f32 %v667_v43, %v467_v44  ;;  %v851_v46 = vpop.f32.mrb[3].mxu1 }
 0x23b   :  { %v471_v47 = vmax.f32 %v468_v45, 0.0 }
 0x23d   :  { %885 = vmatmul.mubr.f32.vlgmr.msra.gmra.mrb[4].mxu0 %v471_v47 }
 0x2ee   :  { %v391_v48 = vpop.f32.mrb[2].mxu0 }
 0x2ef   :  { %v816_v49 = vpop.f32.mrb[3].mxu0  ;;  %888 = vmatpush3.msra.mxu1 %v391_v48 }
 0x2f0   :  { %890 = vmatmul.mubr.msk.f32.vlgmr.msra.gmra.mrb[4].mxu1 %vm114_vm1, %v1373_v3 }
 0x310   :  { %v544_v50 = vpop.f32.mrb[4].mxu0 }
 0x311   :  { %v545_v51 = vadd.f32 %v668_v1, %v544_v50  ;;  %v886_v52 = vpop.f32.mrb[5].mxu0 }
 0x313   :  { %548 = vst [vmem:[#allocation13] sm:$0xff] %v545_v51 }
 0x314   :  { %1145 = shalt.err (!%p1142_p10)
}
 0x315   :  { %s1146_s7 = scalar_lea.hbm %s1472_s9, 128 }
 0x316   :  { %p1147_p11 = scmp.ne.s32.totalorder %s1472_s9, %s1146_s7  ;;  %p1150_p12 = scmp.lt.u32.totalorder %s1146_s7, %s1472_s9 }
 0x318   :  { %p1152_p13 = pnand %p1150_p12, %p1147_p11 }
 0x31a   :  { %1155 = shalt.err (!%p1152_p13)
}
 0x31b   :  { %640 = dma.vmem_to_hbm [thread:$0]  %s638_s23, 128, %s1472_s9, [#allocation15]  }
 0x31c   :  { %s1156_s16 = scalar_lea.vmem %s628_s25, 128  ;;  %p1161_p1 = scmp.lt.s32.totalorder %s628_s25, %s628_s25 }
 0x31d   :  { %p1157_p0 = scmp.ne.s32.totalorder %s628_s25, %s1156_s16  ;;  %p1162_p2 = scmp.lt.s32.totalorder %s1156_s16, %s1156_s16 }
 0x31f   :  { %p1163_p3 = por %p1162_p2, %p1161_p1 }
 0x321   :  { %p1164_p4 = pnand %p1163_p3, %p1157_p0 }
 0x323   :  { %1167 = shalt.err (!%p1164_p4)
}
 0x324   :  { %s1168_s19 = scalar_lea.hbm %s1471_s8, 128 }
 0x325   :  { %p1169_p5 = scmp.ne.s32.totalorder %s1471_s8, %s1168_s19  ;;  %p1172_p6 = scmp.lt.u32.totalorder %s1168_s19, %s1471_s8 }
 0x327   :  { %p1174_p7 = pnand %p1172_p6, %p1169_p5 }
 0x329   :  { %1177 = shalt.err (!%p1174_p7)
}
 0x32a   :  { %630 = dma.vmem_to_hbm [thread:$0]  %s628_s25, 128, %s1471_s8, [#allocation4]  }
 0x32b   :  { %s1225_s13 = smov [#allocation16]  }
 0x32c   :  { %s647_s6 = sshll.u32 %s1225_s13, 4  ;;  %s648_s6 = int_to_ptr.vmem [resolvable:$true] %s647_s6 }
 0x32d   :  { %s1178_s14 = scalar_lea.vmem %s648_s6, 128  ;;  %p1183_p9 = scmp.lt.s32.totalorder %s648_s6, %s648_s6 }
 0x32e   :  { %p1179_p8 = scmp.ne.s32.totalorder %s648_s6, %s1178_s14  ;;  %p1184_p10 = scmp.lt.s32.totalorder %s1178_s14, %s1178_s14 }
 0x330   :  { %p1185_p11 = por %p1184_p10, %p1183_p9 }
 0x332   :  { %p1186_p12 = pnand %p1185_p11, %p1179_p8 }
 0x3c3   :  { %v616_v3 = vpop.f32.mrb[4].mxu1 }
 0x3c4   :  { %620 = vst [vmem:[#allocation16] sm:$0xff] %v616_v3  ;;  %v891_v53 = vpop.f32.mrb[5].mxu1 }
 0x3c5   :  { %1189 = shalt.err (!%p1186_p12)
}
 0x3c6   :  { %s1190_s5 = scalar_lea.hbm %s1473_s10, 128 }
 0x3c7   :  { %p1191_p13 = scmp.ne.s32.totalorder %s1473_s10, %s1190_s5  ;;  %p1194_p0 = scmp.lt.u32.totalorder %s1190_s5, %s1473_s10 }
 0x3c9   :  { %p1196_p1 = pnand %p1194_p0, %p1191_p13 }
 0x3cb   :  { %1199 = shalt.err (!%p1196_p1)
}
 0x3cc   :  { %650 = dma.vmem_to_hbm [thread:$0]  %s648_s6, 128, %s1473_s10, [#allocation15]  }
 0x3cd   :  { %1208 = dma.done.wait [#allocation4], 128  }
 0x3ce   :  { %1209 = vsyncadd [#allocation4], 4294967168 }
 0x3cf   :  { %1210 = dma.done.wait [#allocation15], 256  }
 0x3d0   :  { %1211 = vsyncadd [#allocation15], 4294967040 }
 0x3d1   :  { %660 = vsyncpa [#allocation3], 1 }
 0x3d2   :  { %661 = vsyncpa [#allocation6], 1 }
 0x3d3   :  { %662 = vsyncpa [#allocation9], 1 }
 0x3d4   :  { %663 = vsyncpa [#allocation12], 1 }
 0x3d5   :  { %664 = vsyncpa [#allocation4], 1 }
 0x3d6   :  { %665 = vsyncpa [#allocation15], 1 }

</bundles_post_ra>
